<compile_context>
chip_gen: v5e
topology: v5e:2x2
jax: 0.10.0
libtpu: 0.0.40
codegen_flags: <defaults>
</compile_context>

<pallas_src>
import functools

import jax
import jax.numpy as jnp
from jax import lax
from jax.experimental import pallas as pl
from jax.experimental.pallas import tpu as pltpu
import numpy as np


def _log_softmax_lastdim(x):
    m = jnp.max(x, axis=-1, keepdims=True)
    return x - (jnp.log(jnp.sum(jnp.exp(x - m), axis=-1, keepdims=True)) + m)


# --------------------------------------------------------------------------
# Fused kernel: LSTM recurrence + attention + concat-Linear/tanh + out-Linear
# + final log_softmax, single invocation (no grid).
# --------------------------------------------------------------------------
def _make_decoder_kernel(T, B, S, H, V):
    def kernel(emb_ref, h0_ref, c0_ref, wih_ref, whh_ref, b_ref,
               enc_ref, wa_ref, ba_ref, wc1_ref, wc2_ref, bc_ref,
               wo_ref, bo_ref,
               out_ref, hn_ref, cn_ref, aw_ref,
               rnn_s):
        mmdt = wih_ref.dtype        # matmul-operand dtype (float32 or bfloat16)

        # ---- hoisted input projection: ONE matmul over all T*B rows -------
        # emb_ref rows are time-major: row = t*B + b.
        gx = jnp.dot(emb_ref[...], wih_ref[...],
                     preferred_element_type=jnp.float32) + b_ref[...]   # (T*B, 4H) f32

        # ---- LSTM recurrence, fully unrolled over T (gate order i,f,g,o) ---
        h = h0_ref[...]                                                  # (B, H) f32
        c = c0_ref[...]                                                  # (B, H) f32
        whh = whh_ref[...]                                               # (H, 4H)
        for t in range(T):
            gates = gx[t * B:(t + 1) * B, :] + jnp.dot(
                h.astype(mmdt), whh, preferred_element_type=jnp.float32)  # (B, 4H)
            i_g = jax.nn.sigmoid(gates[:, 0 * H:1 * H])
            f_g = jax.nn.sigmoid(gates[:, 1 * H:2 * H])
            g_g = jnp.tanh(gates[:, 2 * H:3 * H])
            o_g = jax.nn.sigmoid(gates[:, 3 * H:4 * H])
            c = f_g * c + i_g * g_g
            h = o_g * jnp.tanh(c)
            for b in range(B):
                rnn_s[b, t:t + 1, :] = h[b:b + 1, :]                     # keep rnn in VMEM
        hn_ref[...] = h
        cn_ref[...] = c

        # ---- attention projection over all B*S rows at once ----------------
        # enc_ref rows are batch-major: row = b*S + s.
        enc_proj = jnp.dot(enc_ref[...], wa_ref[...],
                           preferred_element_type=jnp.float32) + ba_ref[...]  # (B*S, H)

        wc1 = wc1_ref[...]
        wc2 = wc2_ref[...]
        wo = wo_ref[...]
        # ---- per-batch bmm + output head (B=2, unrolled) --------------------
        for b in range(B):
            rnn_b = rnn_s[b]                                  # (T, H) f32
            enc_b = enc_ref[b * S:(b + 1) * S, :]             # (S, H) mm dtype
            proj_b = enc_proj[b * S:(b + 1) * S, :]           # (S, H) f32

            scores = lax.dot_general(                          # rnn_b @ proj_b^T
                rnn_b.astype(mmdt), proj_b.astype(mmdt),
                (((1,), (1,)), ((), ())),
                preferred_element_type=jnp.float32)            # (T, S)
            energies = jnp.exp(scores)                         # matches torch.exp(...)
            aw_b = _log_softmax_lastdim(energies)              # log_softmax(exp(.))
            aw_ref[b] = aw_b

            ctx = jnp.dot(aw_b.astype(mmdt), enc_b,
                          preferred_element_type=jnp.float32)  # (T, H)
            # concat Linear: cat([rnn, ctx]) @ Wc^T == rnn @ Wc[:, :H]^T + ctx @ Wc[:, H:]^T
            pre = (jnp.dot(rnn_b.astype(mmdt), wc1, preferred_element_type=jnp.float32)
                   + jnp.dot(ctx.astype(mmdt), wc2, preferred_element_type=jnp.float32)
                   + bc_ref[...])
            co = jnp.tanh(pre)                                 # (T, H)
            logits = jnp.dot(co.astype(mmdt), wo,
                             preferred_element_type=jnp.float32) + bo_ref[...]  # (T, V)
            out_ref[b] = _log_softmax_lastdim(logits)

    return kernel


# --------------------------------------------------------------------------
# Wrapper: embedding gather + parameter prep + single pallas_call.
# --------------------------------------------------------------------------
def decoder_atten_forward(params, input_seq, last_hidden, encoder_output,
                          matmul_dtype=jnp.float32):
    emb_table = params["embedding"]
    T, B = input_seq.shape
    H = emb_table.shape[1]
    S = encoder_output.shape[0]
    V = params["wo"].shape[0]

    # Embedding gather; free reshape to time-major rows (row = t*B + b).
    embedded = jnp.take(emb_table, input_seq, axis=0)                  # (T, B, H)
    emb_flat = embedded.reshape(T * B, H).astype(matmul_dtype)

    h0, c0 = last_hidden                                               # (1, B, H) each
    h0 = h0[0].astype(jnp.float32)
    c0 = c0[0].astype(jnp.float32)

    # Weight prep (in a real model these transposes/casts live in param storage).
    wih_t = jnp.transpose(params["w_ih"]).astype(matmul_dtype)         # (H, 4H)
    whh_t = jnp.transpose(params["w_hh"]).astype(matmul_dtype)         # (H, 4H)
    bias = (params["b_ih"] + params["b_hh"]).reshape(1, 4 * H).astype(jnp.float32)
    wa_t = jnp.transpose(params["wa"]).astype(matmul_dtype)            # (H, H)
    ba = params["ba"].reshape(1, H).astype(jnp.float32)
    wc1_t = jnp.transpose(params["wc"][:, :H]).astype(matmul_dtype)    # (H, H)
    wc2_t = jnp.transpose(params["wc"][:, H:]).astype(matmul_dtype)    # (H, H)
    bc = params["bc"].reshape(1, H).astype(jnp.float32)
    wo_t = jnp.transpose(params["wo"]).astype(matmul_dtype)            # (H, V)
    bo = params["bo"].reshape(1, V).astype(jnp.float32)

    # Encoder to batch-major flattened rows (row = b*S + s).  At (S,B,H)=2 KB
    # this one layout change is noise and it buys contiguous, safe per-batch
    # row slices inside the kernel (no strided/sublane-gather indexing).
    enc_flat = jnp.transpose(encoder_output, (1, 0, 2)).reshape(B * S, H)
    enc_flat = enc_flat.astype(matmul_dtype)

    kernel = _make_decoder_kernel(T, B, S, H, V)
    out_shapes = (
        jax.ShapeDtypeStruct((B, T, V), jnp.float32),   # log_softmax(out), batch-major
        jax.ShapeDtypeStruct((B, H), jnp.float32),      # h_n
        jax.ShapeDtypeStruct((B, H), jnp.float32),      # c_n
        jax.ShapeDtypeStruct((B, T, S), jnp.float32),   # attention weights
    )
    out_bt, h_n, c_n, aw = pl.pallas_call(
        kernel,
        out_shape=out_shapes,
        scratch_shapes=[pltpu.VMEM((B, T, H), jnp.float32)],
    )(emb_flat, h0, c0, wih_t, whh_t, bias, enc_flat, wa_t, ba,
      wc1_t, wc2_t, bc, wo_t, bo)

    # TODO(synk): on v7x (2 TensorCores) a leading batch-parallel grid axis would
    # engage the second core; kept single-invocation here for these tiny shapes.
    output = jnp.transpose(out_bt, (1, 0, 2))                          # (T, B, V)
    return output, (h_n[None], c_n[None]), aw


# --------------------------------------------------------------------------
# Pure-JAX reference (mirrors the PyTorch forward exactly) for sanity check.
# --------------------------------------------------------------------------
def decoder_atten_reference(params, input_seq, last_hidden, encoder_output):
    emb = params["embedding"]
    H = emb.shape[1]
    embedded = jnp.take(emb, input_seq, axis=0)
    h = last_hidden[0][0]
    c = last_hidden[1][0]
    w_ih, w_hh = params["w_ih"], params["w_hh"]
    b = params["b_ih"] + params["b_hh"]
    ys = []
    for t in range(embedded.shape[0]):
        gates = embedded[t] @ w_ih.T + h @ w_hh.T + b
        i_g = jax.nn.sigmoid(gates[:, :H])
        f_g = jax.nn.sigmoid(gates[:, H:2 * H])
        g_g = jnp.tanh(gates[:, 2 * H:3 * H])
        o_g = jax.nn.sigmoid(gates[:, 3 * H:])
        c = f_g * c + i_g * g_g
        h = o_g * jnp.tanh(c)
        ys.append(h)
    rnn_out = jnp.stack(ys, 0)                                   # (T, B, H)
    rnn_bt = rnn_out.transpose(1, 0, 2)
    enc_bt = encoder_output.transpose(1, 0, 2)
    enc_proj = enc_bt @ params["wa"].T + params["ba"]            # (B, S, H)
    energies = jnp.exp(jnp.einsum('bth,bsh->bts', rnn_bt, enc_proj))
    aw = jax.nn.log_softmax(energies, axis=2)                    # (B, T, S)
    context = jnp.einsum('bts,bsh->bth', aw, enc_bt)             # (B, T, H)
    context_tb = context.transpose(1, 0, 2)
    cat = jnp.concatenate([rnn_out, context_tb], axis=2)
    co = jnp.tanh(cat @ params["wc"].T + params["bc"])
    logits = co @ params["wo"].T + params["bo"]
    out = jax.nn.log_softmax(logits, axis=2)
    return out, (h[None], c[None]), aw


if __name__ == "__main__":
    # Small, deterministic shapes consistent with the module.
    B, H, V = 2, 32, 64           # batch, hidden_size, output_size
    T, S = 8, 8                   # target length, encoder length

    key = jax.random.PRNGKey(0)
    keys = jax.random.split(key, 16)

    params = {
        "embedding": 0.1 * jax.random.normal(keys[0], (V, H), jnp.float32),
        "w_ih": 0.1 * jax.random.normal(keys[1], (4 * H, H), jnp.float32),
        "w_hh": 0.1 * jax.random.normal(keys[2], (4 * H, H), jnp.float32),
        "b_ih": 0.1 * jax.random.normal(keys[3], (4 * H,), jnp.float32),
        "b_hh": 0.1 * jax.random.normal(keys[4], (4 * H,), jnp.float32),
        "wa": 0.1 * jax.random.normal(keys[5], (H, H), jnp.float32),
        "ba": 0.1 * jax.random.normal(keys[6], (H,), jnp.float32),
        "wc": 0.1 * jax.random.normal(keys[7], (H, 2 * H), jnp.float32),
        "bc": 0.1 * jax.random.normal(keys[8], (H,), jnp.float32),
        "wo": 0.1 * jax.random.normal(keys[9], (V, H), jnp.float32),
        "bo": 0.1 * jax.random.normal(keys[10], (V,), jnp.float32),
    }

    input_seq = jax.random.randint(keys[11], (T, B), 0, V, jnp.int32)
    h0 = 0.1 * jax.random.normal(keys[12], (1, B, H), jnp.float32)
    c0 = 0.1 * jax.random.normal(keys[13], (1, B, H), jnp.float32)
    encoder_output = 0.3 * jax.random.normal(keys[14], (S, B, H), jnp.float32)

    fwd_f32 = jax.jit(functools.partial(decoder_atten_forward,
                                        matmul_dtype=jnp.float32))
    fwd_bf16 = jax.jit(functools.partial(decoder_atten_forward,
                                         matmul_dtype=jnp.bfloat16))

    # ---- f32 path: tight structural check against the pure-JAX reference ----
    out, (h_n, c_n), aw = fwd_f32(params, input_seq, (h0, c0), encoder_output)
    jax.block_until_ready((out, h_n, c_n, aw))

    with jax.default_matmul_precision("highest"):
        ref_out, (ref_h, ref_c), ref_aw = decoder_atten_reference(
            params, input_seq, (h0, c0), encoder_output)
        jax.block_until_ready((ref_out, ref_h, ref_c, ref_aw))

    np.testing.assert_allclose(np.asarray(out), np.asarray(ref_out),
                               rtol=1e-3, atol=1e-3)
    np.testing.assert_allclose(np.asarray(aw), np.asarray(ref_aw),
                               rtol=1e-3, atol=1e-3)
    np.testing.assert_allclose(np.asarray(h_n), np.asarray(ref_h),
                               rtol=1e-3, atol=1e-3)
    np.testing.assert_allclose(np.asarray(c_n), np.asarray(ref_c),
                               rtol=1e-3, atol=1e-3)

    # ---- bf16 matmul-operand path (v6e/v7x MXU friendly), looser tolerance ----
    out16, (h16, c16), aw16 = fwd_bf16(params, input_seq, (h0, c0), encoder_output)
    jax.block_until_ready((out16, h16, c16, aw16))
    np.testing.assert_allclose(np.asarray(out16), np.asarray(ref_out),
                               rtol=5e-2, atol=5e-2)
    np.testing.assert_allclose(np.asarray(aw16), np.asarray(ref_aw),
                               rtol=5e-2, atol=5e-2)
    np.testing.assert_allclose(np.asarray(h16), np.asarray(ref_h),
                               rtol=5e-2, atol=5e-2)
    np.testing.assert_allclose(np.asarray(c16), np.asarray(ref_c),
                               rtol=5e-2, atol=5e-2)

    print("KERNEL_OK")
</pallas_src>

<mosaic_0001>
module attributes {stable_mosaic.version = 11 : i64} {
  func.func @kernel(%arg0: memref<16x32xf32, #tpu.memory_space<vmem>>, %arg1: memref<2x32xf32, #tpu.memory_space<vmem>>, %arg2: memref<2x32xf32, #tpu.memory_space<vmem>>, %arg3: memref<32x128xf32, #tpu.memory_space<vmem>>, %arg4: memref<32x128xf32, #tpu.memory_space<vmem>>, %arg5: memref<1x128xf32, #tpu.memory_space<vmem>>, %arg6: memref<16x32xf32, #tpu.memory_space<vmem>>, %arg7: memref<32x32xf32, #tpu.memory_space<vmem>>, %arg8: memref<1x32xf32, #tpu.memory_space<vmem>>, %arg9: memref<32x32xf32, #tpu.memory_space<vmem>>, %arg10: memref<32x32xf32, #tpu.memory_space<vmem>>, %arg11: memref<1x32xf32, #tpu.memory_space<vmem>>, %arg12: memref<32x64xf32, #tpu.memory_space<vmem>>, %arg13: memref<1x64xf32, #tpu.memory_space<vmem>>, %arg14: memref<2x8x64xf32, #tpu.memory_space<vmem>>, %arg15: memref<2x32xf32, #tpu.memory_space<vmem>>, %arg16: memref<2x32xf32, #tpu.memory_space<vmem>>, %arg17: memref<2x8x8xf32, #tpu.memory_space<vmem>>, %arg18: memref<2x8x32xf32, #tpu.memory_space<vmem>>) attributes {dimension_semantics = [], scalar_prefetch = 0 : i64, scratch_operands = 1 : i64, tpu.core_type = #tpu.core_type<tc>} {
    %c0 = arith.constant 0 : index
    %c0_0 = arith.constant 0 : index
    %0 = vector.load %arg0[%c0, %c0_0] : memref<16x32xf32, #tpu.memory_space<vmem>>, vector<16x32xf32>
    %c0_1 = arith.constant 0 : index
    %c0_2 = arith.constant 0 : index
    %1 = vector.load %arg3[%c0_1, %c0_2] : memref<32x128xf32, #tpu.memory_space<vmem>>, vector<32x128xf32>
    %cst = arith.constant dense<0.000000e+00> : vector<16x128xf32>
    %2 = tpu.matmul %0, %1, %cst {dimension_numbers = #tpu.dot_dimension_numbers<[1], [0], [0], [1], [0, 0, 1, 1], [], []>} : vector<16x32xf32>, vector<32x128xf32>, vector<16x128xf32> -> vector<16x128xf32>
    %c0_3 = arith.constant 0 : index
    %c0_4 = arith.constant 0 : index
    %3 = vector.load %arg5[%c0_3, %c0_4] : memref<1x128xf32, #tpu.memory_space<vmem>>, vector<1x128xf32>
    %4 = vector.broadcast %3 : vector<1x128xf32> to vector<16x128xf32>
    %5 = arith.addf %2, %4 : vector<16x128xf32>
    %c0_5 = arith.constant 0 : index
    %c0_6 = arith.constant 0 : index
    %6 = vector.load %arg1[%c0_5, %c0_6] : memref<2x32xf32, #tpu.memory_space<vmem>>, vector<2x32xf32>
    %c0_7 = arith.constant 0 : index
    %c0_8 = arith.constant 0 : index
    %7 = vector.load %arg2[%c0_7, %c0_8] : memref<2x32xf32, #tpu.memory_space<vmem>>, vector<2x32xf32>
    %c0_9 = arith.constant 0 : index
    %c0_10 = arith.constant 0 : index
    %8 = vector.load %arg4[%c0_9, %c0_10] : memref<32x128xf32, #tpu.memory_space<vmem>>, vector<32x128xf32>
    %9 = vector.extract_strided_slice %5 {offsets = [0, 0], sizes = [2, 128], strides = [1, 1]} : vector<16x128xf32> to vector<2x128xf32>
    %cst_11 = arith.constant dense<0.000000e+00> : vector<2x128xf32>
    %10 = tpu.matmul %6, %8, %cst_11 {dimension_numbers = #tpu.dot_dimension_numbers<[1], [0], [0], [1], [0, 0, 1, 1], [], []>} : vector<2x32xf32>, vector<32x128xf32>, vector<2x128xf32> -> vector<2x128xf32>
    %11 = arith.addf %9, %10 : vector<2x128xf32>
    %12 = vector.extract_strided_slice %11 {offsets = [0, 0], sizes = [2, 32], strides = [1, 1]} : vector<2x128xf32> to vector<2x32xf32>
    %13 = arith.negf %12 : vector<2x32xf32>
    %14 = math.exp %13 : vector<2x32xf32>
    %cst_12 = arith.constant 1.000000e+00 : f32
    %15 = vector.broadcast %cst_12 : f32 to vector<2x32xf32>
    %16 = arith.addf %15, %14 : vector<2x32xf32>
    %17 = arith.divf %15, %16 : vector<2x32xf32>
    %18 = vector.extract_strided_slice %11 {offsets = [0, 32], sizes = [2, 32], strides = [1, 1]} : vector<2x128xf32> to vector<2x32xf32>
    %19 = arith.negf %18 : vector<2x32xf32>
    %20 = math.exp %19 : vector<2x32xf32>
    %cst_13 = arith.constant 1.000000e+00 : f32
    %21 = vector.broadcast %cst_13 : f32 to vector<2x32xf32>
    %22 = arith.addf %21, %20 : vector<2x32xf32>
    %23 = arith.divf %21, %22 : vector<2x32xf32>
    %24 = vector.extract_strided_slice %11 {offsets = [0, 64], sizes = [2, 32], strides = [1, 1]} : vector<2x128xf32> to vector<2x32xf32>
    %25 = math.tanh %24 : vector<2x32xf32>
    %26 = vector.extract_strided_slice %11 {offsets = [0, 96], sizes = [2, 32], strides = [1, 1]} : vector<2x128xf32> to vector<2x32xf32>
    %27 = arith.negf %26 : vector<2x32xf32>
    %28 = math.exp %27 : vector<2x32xf32>
    %cst_14 = arith.constant 1.000000e+00 : f32
    %29 = vector.broadcast %cst_14 : f32 to vector<2x32xf32>
    %30 = arith.addf %29, %28 : vector<2x32xf32>
    %31 = arith.divf %29, %30 : vector<2x32xf32>
    %32 = arith.mulf %23, %7 : vector<2x32xf32>
    %33 = arith.mulf %17, %25 : vector<2x32xf32>
    %34 = arith.addf %32, %33 : vector<2x32xf32>
    %35 = math.tanh %34 : vector<2x32xf32>
    %36 = arith.mulf %31, %35 : vector<2x32xf32>
    %37 = vector.extract_strided_slice %36 {offsets = [0, 0], sizes = [1, 32], strides = [1, 1]} : vector<2x32xf32> to vector<1x32xf32>
    %c0_15 = arith.constant 0 : index
    %c0_16 = arith.constant 0 : index
    %c0_17 = arith.constant 0 : index
    %38 = vector.load %arg18[%c0_15, %c0_16, %c0_17] : memref<2x8x32xf32, #tpu.memory_space<vmem>>, vector<1x1x32xf32>
    %39 = vector.shape_cast %38 : vector<1x1x32xf32> to vector<1x32xf32>
    %40 = vector.shape_cast %37 : vector<1x32xf32> to vector<1x1x32xf32>
    tpu.vector_store %arg18[%c0_15, %c0_16, %c0_17], %40 {strides = array<i32>} : memref<2x8x32xf32, #tpu.memory_space<vmem>>, vector<1x1x32xf32>,
    %41 = vector.extract_strided_slice %36 {offsets = [1, 0], sizes = [1, 32], strides = [1, 1]} : vector<2x32xf32> to vector<1x32xf32>
    %c1 = arith.constant 1 : index
    %c0_18 = arith.constant 0 : index
    %c0_19 = arith.constant 0 : index
    %42 = vector.load %arg18[%c1, %c0_18, %c0_19] : memref<2x8x32xf32, #tpu.memory_space<vmem>>, vector<1x1x32xf32>
    %43 = vector.shape_cast %42 : vector<1x1x32xf32> to vector<1x32xf32>
    %44 = vector.shape_cast %41 : vector<1x32xf32> to vector<1x1x32xf32>
    tpu.vector_store %arg18[%c1, %c0_18, %c0_19], %44 {strides = array<i32>} : memref<2x8x32xf32, #tpu.memory_space<vmem>>, vector<1x1x32xf32>,
    %45 = vector.extract_strided_slice %5 {offsets = [2, 0], sizes = [2, 128], strides = [1, 1]} : vector<16x128xf32> to vector<2x128xf32>
    %cst_20 = arith.constant dense<0.000000e+00> : vector<2x128xf32>
    %46 = tpu.matmul %36, %8, %cst_20 {dimension_numbers = #tpu.dot_dimension_numbers<[1], [0], [0], [1], [0, 0, 1, 1], [], []>} : vector<2x32xf32>, vector<32x128xf32>, vector<2x128xf32> -> vector<2x128xf32>
    %47 = arith.addf %45, %46 : vector<2x128xf32>
    %48 = vector.extract_strided_slice %47 {offsets = [0, 0], sizes = [2, 32], strides = [1, 1]} : vector<2x128xf32> to vector<2x32xf32>
    %49 = arith.negf %48 : vector<2x32xf32>
    %50 = math.exp %49 : vector<2x32xf32>
    %cst_21 = arith.constant 1.000000e+00 : f32
    %51 = vector.broadcast %cst_21 : f32 to vector<2x32xf32>
    %52 = arith.addf %51, %50 : vector<2x32xf32>
    %53 = arith.divf %51, %52 : vector<2x32xf32>
    %54 = vector.extract_strided_slice %47 {offsets = [0, 32], sizes = [2, 32], strides = [1, 1]} : vector<2x128xf32> to vector<2x32xf32>
    %55 = arith.negf %54 : vector<2x32xf32>
    %56 = math.exp %55 : vector<2x32xf32>
    %cst_22 = arith.constant 1.000000e+00 : f32
    %57 = vector.broadcast %cst_22 : f32 to vector<2x32xf32>
    %58 = arith.addf %57, %56 : vector<2x32xf32>
    %59 = arith.divf %57, %58 : vector<2x32xf32>
    %60 = vector.extract_strided_slice %47 {offsets = [0, 64], sizes = [2, 32], strides = [1, 1]} : vector<2x128xf32> to vector<2x32xf32>
    %61 = math.tanh %60 : vector<2x32xf32>
    %62 = vector.extract_strided_slice %47 {offsets = [0, 96], sizes = [2, 32], strides = [1, 1]} : vector<2x128xf32> to vector<2x32xf32>
    %63 = arith.negf %62 : vector<2x32xf32>
    %64 = math.exp %63 : vector<2x32xf32>
    %cst_23 = arith.constant 1.000000e+00 : f32
    %65 = vector.broadcast %cst_23 : f32 to vector<2x32xf32>
    %66 = arith.addf %65, %64 : vector<2x32xf32>
    %67 = arith.divf %65, %66 : vector<2x32xf32>
    %68 = arith.mulf %59, %34 : vector<2x32xf32>
    %69 = arith.mulf %53, %61 : vector<2x32xf32>
    %70 = arith.addf %68, %69 : vector<2x32xf32>
    %71 = math.tanh %70 : vector<2x32xf32>
    %72 = arith.mulf %67, %71 : vector<2x32xf32>
    %73 = vector.extract_strided_slice %72 {offsets = [0, 0], sizes = [1, 32], strides = [1, 1]} : vector<2x32xf32> to vector<1x32xf32>
    %c0_24 = arith.constant 0 : index
    %c1_25 = arith.constant 1 : index
    %c0_26 = arith.constant 0 : index
    %74 = vector.load %arg18[%c0_24, %c1_25, %c0_26] : memref<2x8x32xf32, #tpu.memory_space<vmem>>, vector<1x1x32xf32>
    %75 = vector.shape_cast %74 : vector<1x1x32xf32> to vector<1x32xf32>
    %76 = vector.shape_cast %73 : vector<1x32xf32> to vector<1x1x32xf32>
    tpu.vector_store %arg18[%c0_24, %c1_25, %c0_26], %76 {strides = array<i32>} : memref<2x8x32xf32, #tpu.memory_space<vmem>>, vector<1x1x32xf32>,
    %77 = vector.extract_strided_slice %72 {offsets = [1, 0], sizes = [1, 32], strides = [1, 1]} : vector<2x32xf32> to vector<1x32xf32>
    %c1_27 = arith.constant 1 : index
    %c1_28 = arith.constant 1 : index
    %c0_29 = arith.constant 0 : index
    %78 = vector.load %arg18[%c1_27, %c1_28, %c0_29] : memref<2x8x32xf32, #tpu.memory_space<vmem>>, vector<1x1x32xf32>
    %79 = vector.shape_cast %78 : vector<1x1x32xf32> to vector<1x32xf32>
    %80 = vector.shape_cast %77 : vector<1x32xf32> to vector<1x1x32xf32>
    tpu.vector_store %arg18[%c1_27, %c1_28, %c0_29], %80 {strides = array<i32>} : memref<2x8x32xf32, #tpu.memory_space<vmem>>, vector<1x1x32xf32>,
    %81 = vector.extract_strided_slice %5 {offsets = [4, 0], sizes = [2, 128], strides = [1, 1]} : vector<16x128xf32> to vector<2x128xf32>
    %cst_30 = arith.constant dense<0.000000e+00> : vector<2x128xf32>
    %82 = tpu.matmul %72, %8, %cst_30 {dimension_numbers = #tpu.dot_dimension_numbers<[1], [0], [0], [1], [0, 0, 1, 1], [], []>} : vector<2x32xf32>, vector<32x128xf32>, vector<2x128xf32> -> vector<2x128xf32>
    %83 = arith.addf %81, %82 : vector<2x128xf32>
    %84 = vector.extract_strided_slice %83 {offsets = [0, 0], sizes = [2, 32], strides = [1, 1]} : vector<2x128xf32> to vector<2x32xf32>
    %85 = arith.negf %84 : vector<2x32xf32>
    %86 = math.exp %85 : vector<2x32xf32>
    %cst_31 = arith.constant 1.000000e+00 : f32
    %87 = vector.broadcast %cst_31 : f32 to vector<2x32xf32>
    %88 = arith.addf %87, %86 : vector<2x32xf32>
    %89 = arith.divf %87, %88 : vector<2x32xf32>
    %90 = vector.extract_strided_slice %83 {offsets = [0, 32], sizes = [2, 32], strides = [1, 1]} : vector<2x128xf32> to vector<2x32xf32>
    %91 = arith.negf %90 : vector<2x32xf32>
    %92 = math.exp %91 : vector<2x32xf32>
    %cst_32 = arith.constant 1.000000e+00 : f32
    %93 = vector.broadcast %cst_32 : f32 to vector<2x32xf32>
    %94 = arith.addf %93, %92 : vector<2x32xf32>
    %95 = arith.divf %93, %94 : vector<2x32xf32>
    %96 = vector.extract_strided_slice %83 {offsets = [0, 64], sizes = [2, 32], strides = [1, 1]} : vector<2x128xf32> to vector<2x32xf32>
    %97 = math.tanh %96 : vector<2x32xf32>
    %98 = vector.extract_strided_slice %83 {offsets = [0, 96], sizes = [2, 32], strides = [1, 1]} : vector<2x128xf32> to vector<2x32xf32>
    %99 = arith.negf %98 : vector<2x32xf32>
    %100 = math.exp %99 : vector<2x32xf32>
    %cst_33 = arith.constant 1.000000e+00 : f32
    %101 = vector.broadcast %cst_33 : f32 to vector<2x32xf32>
    %102 = arith.addf %101, %100 : vector<2x32xf32>
    %103 = arith.divf %101, %102 : vector<2x32xf32>
    %104 = arith.mulf %95, %70 : vector<2x32xf32>
    %105 = arith.mulf %89, %97 : vector<2x32xf32>
    %106 = arith.addf %104, %105 : vector<2x32xf32>
    %107 = math.tanh %106 : vector<2x32xf32>
    %108 = arith.mulf %103, %107 : vector<2x32xf32>
    %109 = vector.extract_strided_slice %108 {offsets = [0, 0], sizes = [1, 32], strides = [1, 1]} : vector<2x32xf32> to vector<1x32xf32>
    %c0_34 = arith.constant 0 : index
    %c2 = arith.constant 2 : index
    %c0_35 = arith.constant 0 : index
    %110 = vector.load %arg18[%c0_34, %c2, %c0_35] : memref<2x8x32xf32, #tpu.memory_space<vmem>>, vector<1x1x32xf32>
    %111 = vector.shape_cast %110 : vector<1x1x32xf32> to vector<1x32xf32>
    %112 = vector.shape_cast %109 : vector<1x32xf32> to vector<1x1x32xf32>
    tpu.vector_store %arg18[%c0_34, %c2, %c0_35], %112 {strides = array<i32>} : memref<2x8x32xf32, #tpu.memory_space<vmem>>, vector<1x1x32xf32>,
    %113 = vector.extract_strided_slice %108 {offsets = [1, 0], sizes = [1, 32], strides = [1, 1]} : vector<2x32xf32> to vector<1x32xf32>
    %c1_36 = arith.constant 1 : index
    %c2_37 = arith.constant 2 : index
    %c0_38 = arith.constant 0 : index
    %114 = vector.load %arg18[%c1_36, %c2_37, %c0_38] : memref<2x8x32xf32, #tpu.memory_space<vmem>>, vector<1x1x32xf32>
    %115 = vector.shape_cast %114 : vector<1x1x32xf32> to vector<1x32xf32>
    %116 = vector.shape_cast %113 : vector<1x32xf32> to vector<1x1x32xf32>
    tpu.vector_store %arg18[%c1_36, %c2_37, %c0_38], %116 {strides = array<i32>} : memref<2x8x32xf32, #tpu.memory_space<vmem>>, vector<1x1x32xf32>,
    %117 = vector.extract_strided_slice %5 {offsets = [6, 0], sizes = [2, 128], strides = [1, 1]} : vector<16x128xf32> to vector<2x128xf32>
    %cst_39 = arith.constant dense<0.000000e+00> : vector<2x128xf32>
    %118 = tpu.matmul %108, %8, %cst_39 {dimension_numbers = #tpu.dot_dimension_numbers<[1], [0], [0], [1], [0, 0, 1, 1], [], []>} : vector<2x32xf32>, vector<32x128xf32>, vector<2x128xf32> -> vector<2x128xf32>
    %119 = arith.addf %117, %118 : vector<2x128xf32>
    %120 = vector.extract_strided_slice %119 {offsets = [0, 0], sizes = [2, 32], strides = [1, 1]} : vector<2x128xf32> to vector<2x32xf32>
    %121 = arith.negf %120 : vector<2x32xf32>
    %122 = math.exp %121 : vector<2x32xf32>
    %cst_40 = arith.constant 1.000000e+00 : f32
    %123 = vector.broadcast %cst_40 : f32 to vector<2x32xf32>
    %124 = arith.addf %123, %122 : vector<2x32xf32>
    %125 = arith.divf %123, %124 : vector<2x32xf32>
    %126 = vector.extract_strided_slice %119 {offsets = [0, 32], sizes = [2, 32], strides = [1, 1]} : vector<2x128xf32> to vector<2x32xf32>
    %127 = arith.negf %126 : vector<2x32xf32>
    %128 = math.exp %127 : vector<2x32xf32>
    %cst_41 = arith.constant 1.000000e+00 : f32
    %129 = vector.broadcast %cst_41 : f32 to vector<2x32xf32>
    %130 = arith.addf %129, %128 : vector<2x32xf32>
    %131 = arith.divf %129, %130 : vector<2x32xf32>
    %132 = vector.extract_strided_slice %119 {offsets = [0, 64], sizes = [2, 32], strides = [1, 1]} : vector<2x128xf32> to vector<2x32xf32>
    %133 = math.tanh %132 : vector<2x32xf32>
    %134 = vector.extract_strided_slice %119 {offsets = [0, 96], sizes = [2, 32], strides = [1, 1]} : vector<2x128xf32> to vector<2x32xf32>
    %135 = arith.negf %134 : vector<2x32xf32>
    %136 = math.exp %135 : vector<2x32xf32>
    %cst_42 = arith.constant 1.000000e+00 : f32
    %137 = vector.broadcast %cst_42 : f32 to vector<2x32xf32>
    %138 = arith.addf %137, %136 : vector<2x32xf32>
    %139 = arith.divf %137, %138 : vector<2x32xf32>
    %140 = arith.mulf %131, %106 : vector<2x32xf32>
    %141 = arith.mulf %125, %133 : vector<2x32xf32>
    %142 = arith.addf %140, %141 : vector<2x32xf32>
    %143 = math.tanh %142 : vector<2x32xf32>
    %144 = arith.mulf %139, %143 : vector<2x32xf32>
    %145 = vector.extract_strided_slice %144 {offsets = [0, 0], sizes = [1, 32], strides = [1, 1]} : vector<2x32xf32> to vector<1x32xf32>
    %c0_43 = arith.constant 0 : index
    %c3 = arith.constant 3 : index
    %c0_44 = arith.constant 0 : index
    %146 = vector.load %arg18[%c0_43, %c3, %c0_44] : memref<2x8x32xf32, #tpu.memory_space<vmem>>, vector<1x1x32xf32>
    %147 = vector.shape_cast %146 : vector<1x1x32xf32> to vector<1x32xf32>
    %148 = vector.shape_cast %145 : vector<1x32xf32> to vector<1x1x32xf32>
    tpu.vector_store %arg18[%c0_43, %c3, %c0_44], %148 {strides = array<i32>} : memref<2x8x32xf32, #tpu.memory_space<vmem>>, vector<1x1x32xf32>,
    %149 = vector.extract_strided_slice %144 {offsets = [1, 0], sizes = [1, 32], strides = [1, 1]} : vector<2x32xf32> to vector<1x32xf32>
    %c1_45 = arith.constant 1 : index
    %c3_46 = arith.constant 3 : index
    %c0_47 = arith.constant 0 : index
    %150 = vector.load %arg18[%c1_45, %c3_46, %c0_47] : memref<2x8x32xf32, #tpu.memory_space<vmem>>, vector<1x1x32xf32>
    %151 = vector.shape_cast %150 : vector<1x1x32xf32> to vector<1x32xf32>
    %152 = vector.shape_cast %149 : vector<1x32xf32> to vector<1x1x32xf32>
    tpu.vector_store %arg18[%c1_45, %c3_46, %c0_47], %152 {strides = array<i32>} : memref<2x8x32xf32, #tpu.memory_space<vmem>>, vector<1x1x32xf32>,
    %153 = vector.extract_strided_slice %5 {offsets = [8, 0], sizes = [2, 128], strides = [1, 1]} : vector<16x128xf32> to vector<2x128xf32>
    %cst_48 = arith.constant dense<0.000000e+00> : vector<2x128xf32>
    %154 = tpu.matmul %144, %8, %cst_48 {dimension_numbers = #tpu.dot_dimension_numbers<[1], [0], [0], [1], [0, 0, 1, 1], [], []>} : vector<2x32xf32>, vector<32x128xf32>, vector<2x128xf32> -> vector<2x128xf32>
    %155 = arith.addf %153, %154 : vector<2x128xf32>
    %156 = vector.extract_strided_slice %155 {offsets = [0, 0], sizes = [2, 32], strides = [1, 1]} : vector<2x128xf32> to vector<2x32xf32>
    %157 = arith.negf %156 : vector<2x32xf32>
    %158 = math.exp %157 : vector<2x32xf32>
    %cst_49 = arith.constant 1.000000e+00 : f32
    %159 = vector.broadcast %cst_49 : f32 to vector<2x32xf32>
    %160 = arith.addf %159, %158 : vector<2x32xf32>
    %161 = arith.divf %159, %160 : vector<2x32xf32>
    %162 = vector.extract_strided_slice %155 {offsets = [0, 32], sizes = [2, 32], strides = [1, 1]} : vector<2x128xf32> to vector<2x32xf32>
    %163 = arith.negf %162 : vector<2x32xf32>
    %164 = math.exp %163 : vector<2x32xf32>
    %cst_50 = arith.constant 1.000000e+00 : f32
    %165 = vector.broadcast %cst_50 : f32 to vector<2x32xf32>
    %166 = arith.addf %165, %164 : vector<2x32xf32>
    %167 = arith.divf %165, %166 : vector<2x32xf32>
    %168 = vector.extract_strided_slice %155 {offsets = [0, 64], sizes = [2, 32], strides = [1, 1]} : vector<2x128xf32> to vector<2x32xf32>
    %169 = math.tanh %168 : vector<2x32xf32>
    %170 = vector.extract_strided_slice %155 {offsets = [0, 96], sizes = [2, 32], strides = [1, 1]} : vector<2x128xf32> to vector<2x32xf32>
    %171 = arith.negf %170 : vector<2x32xf32>
    %172 = math.exp %171 : vector<2x32xf32>
    %cst_51 = arith.constant 1.000000e+00 : f32
    %173 = vector.broadcast %cst_51 : f32 to vector<2x32xf32>
    %174 = arith.addf %173, %172 : vector<2x32xf32>
    %175 = arith.divf %173, %174 : vector<2x32xf32>
    %176 = arith.mulf %167, %142 : vector<2x32xf32>
    %177 = arith.mulf %161, %169 : vector<2x32xf32>
    %178 = arith.addf %176, %177 : vector<2x32xf32>
    %179 = math.tanh %178 : vector<2x32xf32>
    %180 = arith.mulf %175, %179 : vector<2x32xf32>
    %181 = vector.extract_strided_slice %180 {offsets = [0, 0], sizes = [1, 32], strides = [1, 1]} : vector<2x32xf32> to vector<1x32xf32>
    %c0_52 = arith.constant 0 : index
    %c4 = arith.constant 4 : index
    %c0_53 = arith.constant 0 : index
    %182 = vector.load %arg18[%c0_52, %c4, %c0_53] : memref<2x8x32xf32, #tpu.memory_space<vmem>>, vector<1x1x32xf32>
    %183 = vector.shape_cast %182 : vector<1x1x32xf32> to vector<1x32xf32>
    %184 = vector.shape_cast %181 : vector<1x32xf32> to vector<1x1x32xf32>
    tpu.vector_store %arg18[%c0_52, %c4, %c0_53], %184 {strides = array<i32>} : memref<2x8x32xf32, #tpu.memory_space<vmem>>, vector<1x1x32xf32>,
    %185 = vector.extract_strided_slice %180 {offsets = [1, 0], sizes = [1, 32], strides = [1, 1]} : vector<2x32xf32> to vector<1x32xf32>
    %c1_54 = arith.constant 1 : index
    %c4_55 = arith.constant 4 : index
    %c0_56 = arith.constant 0 : index
    %186 = vector.load %arg18[%c1_54, %c4_55, %c0_56] : memref<2x8x32xf32, #tpu.memory_space<vmem>>, vector<1x1x32xf32>
    %187 = vector.shape_cast %186 : vector<1x1x32xf32> to vector<1x32xf32>
    %188 = vector.shape_cast %185 : vector<1x32xf32> to vector<1x1x32xf32>
    tpu.vector_store %arg18[%c1_54, %c4_55, %c0_56], %188 {strides = array<i32>} : memref<2x8x32xf32, #tpu.memory_space<vmem>>, vector<1x1x32xf32>,
    %189 = vector.extract_strided_slice %5 {offsets = [10, 0], sizes = [2, 128], strides = [1, 1]} : vector<16x128xf32> to vector<2x128xf32>
    %cst_57 = arith.constant dense<0.000000e+00> : vector<2x128xf32>
    %190 = tpu.matmul %180, %8, %cst_57 {dimension_numbers = #tpu.dot_dimension_numbers<[1], [0], [0], [1], [0, 0, 1, 1], [], []>} : vector<2x32xf32>, vector<32x128xf32>, vector<2x128xf32> -> vector<2x128xf32>
    %191 = arith.addf %189, %190 : vector<2x128xf32>
    %192 = vector.extract_strided_slice %191 {offsets = [0, 0], sizes = [2, 32], strides = [1, 1]} : vector<2x128xf32> to vector<2x32xf32>
    %193 = arith.negf %192 : vector<2x32xf32>
    %194 = math.exp %193 : vector<2x32xf32>
    %cst_58 = arith.constant 1.000000e+00 : f32
    %195 = vector.broadcast %cst_58 : f32 to vector<2x32xf32>
    %196 = arith.addf %195, %194 : vector<2x32xf32>
    %197 = arith.divf %195, %196 : vector<2x32xf32>
    %198 = vector.extract_strided_slice %191 {offsets = [0, 32], sizes = [2, 32], strides = [1, 1]} : vector<2x128xf32> to vector<2x32xf32>
    %199 = arith.negf %198 : vector<2x32xf32>
    %200 = math.exp %199 : vector<2x32xf32>
    %cst_59 = arith.constant 1.000000e+00 : f32
    %201 = vector.broadcast %cst_59 : f32 to vector<2x32xf32>
    %202 = arith.addf %201, %200 : vector<2x32xf32>
    %203 = arith.divf %201, %202 : vector<2x32xf32>
    %204 = vector.extract_strided_slice %191 {offsets = [0, 64], sizes = [2, 32], strides = [1, 1]} : vector<2x128xf32> to vector<2x32xf32>
    %205 = math.tanh %204 : vector<2x32xf32>
    %206 = vector.extract_strided_slice %191 {offsets = [0, 96], sizes = [2, 32], strides = [1, 1]} : vector<2x128xf32> to vector<2x32xf32>
    %207 = arith.negf %206 : vector<2x32xf32>
    %208 = math.exp %207 : vector<2x32xf32>
    %cst_60 = arith.constant 1.000000e+00 : f32
    %209 = vector.broadcast %cst_60 : f32 to vector<2x32xf32>
    %210 = arith.addf %209, %208 : vector<2x32xf32>
    %211 = arith.divf %209, %210 : vector<2x32xf32>
    %212 = arith.mulf %203, %178 : vector<2x32xf32>
    %213 = arith.mulf %197, %205 : vector<2x32xf32>
    %214 = arith.addf %212, %213 : vector<2x32xf32>
    %215 = math.tanh %214 : vector<2x32xf32>
    %216 = arith.mulf %211, %215 : vector<2x32xf32>
    %217 = vector.extract_strided_slice %216 {offsets = [0, 0], sizes = [1, 32], strides = [1, 1]} : vector<2x32xf32> to vector<1x32xf32>
    %c0_61 = arith.constant 0 : index
    %c5 = arith.constant 5 : index
    %c0_62 = arith.constant 0 : index
    %218 = vector.load %arg18[%c0_61, %c5, %c0_62] : memref<2x8x32xf32, #tpu.memory_space<vmem>>, vector<1x1x32xf32>
    %219 = vector.shape_cast %218 : vector<1x1x32xf32> to vector<1x32xf32>
    %220 = vector.shape_cast %217 : vector<1x32xf32> to vector<1x1x32xf32>
    tpu.vector_store %arg18[%c0_61, %c5, %c0_62], %220 {strides = array<i32>} : memref<2x8x32xf32, #tpu.memory_space<vmem>>, vector<1x1x32xf32>,
    %221 = vector.extract_strided_slice %216 {offsets = [1, 0], sizes = [1, 32], strides = [1, 1]} : vector<2x32xf32> to vector<1x32xf32>
    %c1_63 = arith.constant 1 : index
    %c5_64 = arith.constant 5 : index
    %c0_65 = arith.constant 0 : index
    %222 = vector.load %arg18[%c1_63, %c5_64, %c0_65] : memref<2x8x32xf32, #tpu.memory_space<vmem>>, vector<1x1x32xf32>
    %223 = vector.shape_cast %222 : vector<1x1x32xf32> to vector<1x32xf32>
    %224 = vector.shape_cast %221 : vector<1x32xf32> to vector<1x1x32xf32>
    tpu.vector_store %arg18[%c1_63, %c5_64, %c0_65], %224 {strides = array<i32>} : memref<2x8x32xf32, #tpu.memory_space<vmem>>, vector<1x1x32xf32>,
    %225 = vector.extract_strided_slice %5 {offsets = [12, 0], sizes = [2, 128], strides = [1, 1]} : vector<16x128xf32> to vector<2x128xf32>
    %cst_66 = arith.constant dense<0.000000e+00> : vector<2x128xf32>
    %226 = tpu.matmul %216, %8, %cst_66 {dimension_numbers = #tpu.dot_dimension_numbers<[1], [0], [0], [1], [0, 0, 1, 1], [], []>} : vector<2x32xf32>, vector<32x128xf32>, vector<2x128xf32> -> vector<2x128xf32>
    %227 = arith.addf %225, %226 : vector<2x128xf32>
    %228 = vector.extract_strided_slice %227 {offsets = [0, 0], sizes = [2, 32], strides = [1, 1]} : vector<2x128xf32> to vector<2x32xf32>
    %229 = arith.negf %228 : vector<2x32xf32>
    %230 = math.exp %229 : vector<2x32xf32>
    %cst_67 = arith.constant 1.000000e+00 : f32
    %231 = vector.broadcast %cst_67 : f32 to vector<2x32xf32>
    %232 = arith.addf %231, %230 : vector<2x32xf32>
    %233 = arith.divf %231, %232 : vector<2x32xf32>
    %234 = vector.extract_strided_slice %227 {offsets = [0, 32], sizes = [2, 32], strides = [1, 1]} : vector<2x128xf32> to vector<2x32xf32>
    %235 = arith.negf %234 : vector<2x32xf32>
    %236 = math.exp %235 : vector<2x32xf32>
    %cst_68 = arith.constant 1.000000e+00 : f32
    %237 = vector.broadcast %cst_68 : f32 to vector<2x32xf32>
    %238 = arith.addf %237, %236 : vector<2x32xf32>
    %239 = arith.divf %237, %238 : vector<2x32xf32>
    %240 = vector.extract_strided_slice %227 {offsets = [0, 64], sizes = [2, 32], strides = [1, 1]} : vector<2x128xf32> to vector<2x32xf32>
    %241 = math.tanh %240 : vector<2x32xf32>
    %242 = vector.extract_strided_slice %227 {offsets = [0, 96], sizes = [2, 32], strides = [1, 1]} : vector<2x128xf32> to vector<2x32xf32>
    %243 = arith.negf %242 : vector<2x32xf32>
    %244 = math.exp %243 : vector<2x32xf32>
    %cst_69 = arith.constant 1.000000e+00 : f32
    %245 = vector.broadcast %cst_69 : f32 to vector<2x32xf32>
    %246 = arith.addf %245, %244 : vector<2x32xf32>
    %247 = arith.divf %245, %246 : vector<2x32xf32>
    %248 = arith.mulf %239, %214 : vector<2x32xf32>
    %249 = arith.mulf %233, %241 : vector<2x32xf32>
    %250 = arith.addf %248, %249 : vector<2x32xf32>
    %251 = math.tanh %250 : vector<2x32xf32>
    %252 = arith.mulf %247, %251 : vector<2x32xf32>
    %253 = vector.extract_strided_slice %252 {offsets = [0, 0], sizes = [1, 32], strides = [1, 1]} : vector<2x32xf32> to vector<1x32xf32>
    %c0_70 = arith.constant 0 : index
    %c6 = arith.constant 6 : index
    %c0_71 = arith.constant 0 : index
    %254 = vector.load %arg18[%c0_70, %c6, %c0_71] : memref<2x8x32xf32, #tpu.memory_space<vmem>>, vector<1x1x32xf32>
    %255 = vector.shape_cast %254 : vector<1x1x32xf32> to vector<1x32xf32>
    %256 = vector.shape_cast %253 : vector<1x32xf32> to vector<1x1x32xf32>
    tpu.vector_store %arg18[%c0_70, %c6, %c0_71], %256 {strides = array<i32>} : memref<2x8x32xf32, #tpu.memory_space<vmem>>, vector<1x1x32xf32>,
    %257 = vector.extract_strided_slice %252 {offsets = [1, 0], sizes = [1, 32], strides = [1, 1]} : vector<2x32xf32> to vector<1x32xf32>
    %c1_72 = arith.constant 1 : index
    %c6_73 = arith.constant 6 : index
    %c0_74 = arith.constant 0 : index
    %258 = vector.load %arg18[%c1_72, %c6_73, %c0_74] : memref<2x8x32xf32, #tpu.memory_space<vmem>>, vector<1x1x32xf32>
    %259 = vector.shape_cast %258 : vector<1x1x32xf32> to vector<1x32xf32>
    %260 = vector.shape_cast %257 : vector<1x32xf32> to vector<1x1x32xf32>
    tpu.vector_store %arg18[%c1_72, %c6_73, %c0_74], %260 {strides = array<i32>} : memref<2x8x32xf32, #tpu.memory_space<vmem>>, vector<1x1x32xf32>,
    %261 = vector.extract_strided_slice %5 {offsets = [14, 0], sizes = [2, 128], strides = [1, 1]} : vector<16x128xf32> to vector<2x128xf32>
    %cst_75 = arith.constant dense<0.000000e+00> : vector<2x128xf32>
    %262 = tpu.matmul %252, %8, %cst_75 {dimension_numbers = #tpu.dot_dimension_numbers<[1], [0], [0], [1], [0, 0, 1, 1], [], []>} : vector<2x32xf32>, vector<32x128xf32>, vector<2x128xf32> -> vector<2x128xf32>
    %263 = arith.addf %261, %262 : vector<2x128xf32>
    %264 = vector.extract_strided_slice %263 {offsets = [0, 0], sizes = [2, 32], strides = [1, 1]} : vector<2x128xf32> to vector<2x32xf32>
    %265 = arith.negf %264 : vector<2x32xf32>
    %266 = math.exp %265 : vector<2x32xf32>
    %cst_76 = arith.constant 1.000000e+00 : f32
    %267 = vector.broadcast %cst_76 : f32 to vector<2x32xf32>
    %268 = arith.addf %267, %266 : vector<2x32xf32>
    %269 = arith.divf %267, %268 : vector<2x32xf32>
    %270 = vector.extract_strided_slice %263 {offsets = [0, 32], sizes = [2, 32], strides = [1, 1]} : vector<2x128xf32> to vector<2x32xf32>
    %271 = arith.negf %270 : vector<2x32xf32>
    %272 = math.exp %271 : vector<2x32xf32>
    %cst_77 = arith.constant 1.000000e+00 : f32
    %273 = vector.broadcast %cst_77 : f32 to vector<2x32xf32>
    %274 = arith.addf %273, %272 : vector<2x32xf32>
    %275 = arith.divf %273, %274 : vector<2x32xf32>
    %276 = vector.extract_strided_slice %263 {offsets = [0, 64], sizes = [2, 32], strides = [1, 1]} : vector<2x128xf32> to vector<2x32xf32>
    %277 = math.tanh %276 : vector<2x32xf32>
    %278 = vector.extract_strided_slice %263 {offsets = [0, 96], sizes = [2, 32], strides = [1, 1]} : vector<2x128xf32> to vector<2x32xf32>
    %279 = arith.negf %278 : vector<2x32xf32>
    %280 = math.exp %279 : vector<2x32xf32>
    %cst_78 = arith.constant 1.000000e+00 : f32
    %281 = vector.broadcast %cst_78 : f32 to vector<2x32xf32>
    %282 = arith.addf %281, %280 : vector<2x32xf32>
    %283 = arith.divf %281, %282 : vector<2x32xf32>
    %284 = arith.mulf %275, %250 : vector<2x32xf32>
    %285 = arith.mulf %269, %277 : vector<2x32xf32>
    %286 = arith.addf %284, %285 : vector<2x32xf32>
    %287 = math.tanh %286 : vector<2x32xf32>
    %288 = arith.mulf %283, %287 : vector<2x32xf32>
    %289 = vector.extract_strided_slice %288 {offsets = [0, 0], sizes = [1, 32], strides = [1, 1]} : vector<2x32xf32> to vector<1x32xf32>
    %c0_79 = arith.constant 0 : index
    %c7 = arith.constant 7 : index
    %c0_80 = arith.constant 0 : index
    %290 = vector.load %arg18[%c0_79, %c7, %c0_80] : memref<2x8x32xf32, #tpu.memory_space<vmem>>, vector<1x1x32xf32>
    %291 = vector.shape_cast %290 : vector<1x1x32xf32> to vector<1x32xf32>
    %292 = vector.shape_cast %289 : vector<1x32xf32> to vector<1x1x32xf32>
    tpu.vector_store %arg18[%c0_79, %c7, %c0_80], %292 {strides = array<i32>} : memref<2x8x32xf32, #tpu.memory_space<vmem>>, vector<1x1x32xf32>,
    %293 = vector.extract_strided_slice %288 {offsets = [1, 0], sizes = [1, 32], strides = [1, 1]} : vector<2x32xf32> to vector<1x32xf32>
    %c1_81 = arith.constant 1 : index
    %c7_82 = arith.constant 7 : index
    %c0_83 = arith.constant 0 : index
    %294 = vector.load %arg18[%c1_81, %c7_82, %c0_83] : memref<2x8x32xf32, #tpu.memory_space<vmem>>, vector<1x1x32xf32>
    %295 = vector.shape_cast %294 : vector<1x1x32xf32> to vector<1x32xf32>
    %296 = vector.shape_cast %293 : vector<1x32xf32> to vector<1x1x32xf32>
    tpu.vector_store %arg18[%c1_81, %c7_82, %c0_83], %296 {strides = array<i32>} : memref<2x8x32xf32, #tpu.memory_space<vmem>>, vector<1x1x32xf32>,
    %c0_84 = arith.constant 0 : index
    %c0_85 = arith.constant 0 : index
    %297 = vector.load %arg15[%c0_84, %c0_85] : memref<2x32xf32, #tpu.memory_space<vmem>>, vector<2x32xf32>
    tpu.vector_store %arg15[%c0_84, %c0_85], %288 {strides = array<i32>} : memref<2x32xf32, #tpu.memory_space<vmem>>, vector<2x32xf32>,
    %c0_86 = arith.constant 0 : index
    %c0_87 = arith.constant 0 : index
    %298 = vector.load %arg16[%c0_86, %c0_87] : memref<2x32xf32, #tpu.memory_space<vmem>>, vector<2x32xf32>
    tpu.vector_store %arg16[%c0_86, %c0_87], %286 {strides = array<i32>} : memref<2x32xf32, #tpu.memory_space<vmem>>, vector<2x32xf32>,
    %c0_88 = arith.constant 0 : index
    %c0_89 = arith.constant 0 : index
    %299 = vector.load %arg6[%c0_88, %c0_89] : memref<16x32xf32, #tpu.memory_space<vmem>>, vector<16x32xf32>
    %c0_90 = arith.constant 0 : index
    %c0_91 = arith.constant 0 : index
    %300 = vector.load %arg7[%c0_90, %c0_91] : memref<32x32xf32, #tpu.memory_space<vmem>>, vector<32x32xf32>
    %cst_92 = arith.constant dense<0.000000e+00> : vector<16x32xf32>
    %301 = tpu.matmul %299, %300, %cst_92 {dimension_numbers = #tpu.dot_dimension_numbers<[1], [0], [0], [1], [0, 0, 1, 1], [], []>} : vector<16x32xf32>, vector<32x32xf32>, vector<16x32xf32> -> vector<16x32xf32>
    %c0_93 = arith.constant 0 : index
    %c0_94 = arith.constant 0 : index
    %302 = vector.load %arg8[%c0_93, %c0_94] : memref<1x32xf32, #tpu.memory_space<vmem>>, vector<1x32xf32>
    %303 = vector.broadcast %302 : vector<1x32xf32> to vector<16x32xf32>
    %304 = arith.addf %301, %303 : vector<16x32xf32>
    %c0_95 = arith.constant 0 : index
    %c0_96 = arith.constant 0 : index
    %305 = vector.load %arg9[%c0_95, %c0_96] : memref<32x32xf32, #tpu.memory_space<vmem>>, vector<32x32xf32>
    %c0_97 = arith.constant 0 : index
    %c0_98 = arith.constant 0 : index
    %306 = vector.load %arg10[%c0_97, %c0_98] : memref<32x32xf32, #tpu.memory_space<vmem>>, vector<32x32xf32>
    %c0_99 = arith.constant 0 : index
    %c0_100 = arith.constant 0 : index
    %307 = vector.load %arg12[%c0_99, %c0_100] : memref<32x64xf32, #tpu.memory_space<vmem>>, vector<32x64xf32>
    %c0_101 = arith.constant 0 : index
    %c0_102 = arith.constant 0 : index
    %c0_103 = arith.constant 0 : index
    %308 = vector.load %arg18[%c0_101, %c0_102, %c0_103] : memref<2x8x32xf32, #tpu.memory_space<vmem>>, vector<1x8x32xf32>
    %309 = vector.shape_cast %308 : vector<1x8x32xf32> to vector<8x32xf32>
    %c0_104 = arith.constant 0 : index
    %c0_105 = arith.constant 0 : index
    %310 = vector.load %arg6[%c0_104, %c0_105] : memref<16x32xf32, #tpu.memory_space<vmem>>, vector<8x32xf32>
    %311 = vector.extract_strided_slice %304 {offsets = [0, 0], sizes = [8, 32], strides = [1, 1]} : vector<16x32xf32> to vector<8x32xf32>
    %cst_106 = arith.constant dense<0.000000e+00> : vector<8x8xf32>
    %312 = tpu.matmul %309, %311, %cst_106 {dimension_numbers = #tpu.dot_dimension_numbers<[1], [1], [0], [0], [0, 0, 1, 0], [], []>} : vector<8x32xf32>, vector<8x32xf32>, vector<8x8xf32> -> vector<8x8xf32>
    %313 = math.exp %312 : vector<8x8xf32>
    %cst_107 = arith.constant dense<0xFF800000> : vector<8xf32>
    %314 = vector.multi_reduction <maximumf>, %313, %cst_107 [1] : vector<8x8xf32> to vector<8xf32>
    %315 = vector.shape_cast %314 : vector<8xf32> to vector<8x1xf32>
    %316 = vector.broadcast %315 : vector<8x1xf32> to vector<8x8xf32>
    %317 = arith.subf %313, %316 : vector<8x8xf32>
    %318 = math.exp %317 : vector<8x8xf32>
    %cst_108 = arith.constant dense<0.000000e+00> : vector<8xf32>
    %319 = vector.multi_reduction <add>, %318, %cst_108 [1] : vector<8x8xf32> to vector<8xf32>
    %320 = vector.shape_cast %319 : vector<8xf32> to vector<8x1xf32>
    %321 = math.log %320 : vector<8x1xf32>
    %322 = arith.addf %321, %315 : vector<8x1xf32>
    %323 = vector.broadcast %322 : vector<8x1xf32> to vector<8x8xf32>
    %324 = arith.subf %313, %323 : vector<8x8xf32>
    %c0_109 = arith.constant 0 : index
    %c0_110 = arith.constant 0 : index
    %c0_111 = arith.constant 0 : index
    %325 = vector.load %arg17[%c0_109, %c0_110, %c0_111] : memref<2x8x8xf32, #tpu.memory_space<vmem>>, vector<1x8x8xf32>
    %326 = vector.shape_cast %325 : vector<1x8x8xf32> to vector<8x8xf32>
    %327 = vector.shape_cast %324 : vector<8x8xf32> to vector<1x8x8xf32>
    tpu.vector_store %arg17[%c0_109, %c0_110, %c0_111], %327 {strides = array<i32>} : memref<2x8x8xf32, #tpu.memory_space<vmem>>, vector<1x8x8xf32>,
    %cst_112 = arith.constant dense<0.000000e+00> : vector<8x32xf32>
    %328 = tpu.matmul %324, %310, %cst_112 {dimension_numbers = #tpu.dot_dimension_numbers<[1], [0], [0], [1], [0, 0, 1, 1], [], []>} : vector<8x8xf32>, vector<8x32xf32>, vector<8x32xf32> -> vector<8x32xf32>
    %cst_113 = arith.constant dense<0.000000e+00> : vector<8x32xf32>
    %329 = tpu.matmul %309, %305, %cst_113 {dimension_numbers = #tpu.dot_dimension_numbers<[1], [0], [0], [1], [0, 0, 1, 1], [], []>} : vector<8x32xf32>, vector<32x32xf32>, vector<8x32xf32> -> vector<8x32xf32>
    %cst_114 = arith.constant dense<0.000000e+00> : vector<8x32xf32>
    %330 = tpu.matmul %328, %306, %cst_114 {dimension_numbers = #tpu.dot_dimension_numbers<[1], [0], [0], [1], [0, 0, 1, 1], [], []>} : vector<8x32xf32>, vector<32x32xf32>, vector<8x32xf32> -> vector<8x32xf32>
    %331 = arith.addf %329, %330 : vector<8x32xf32>
    %c0_115 = arith.constant 0 : index
    %c0_116 = arith.constant 0 : index
    %332 = vector.load %arg11[%c0_115, %c0_116] : memref<1x32xf32, #tpu.memory_space<vmem>>, vector<1x32xf32>
    %333 = vector.broadcast %332 : vector<1x32xf32> to vector<8x32xf32>
    %334 = arith.addf %331, %333 : vector<8x32xf32>
    %335 = math.tanh %334 : vector<8x32xf32>
    %cst_117 = arith.constant dense<0.000000e+00> : vector<8x64xf32>
    %336 = tpu.matmul %335, %307, %cst_117 {dimension_numbers = #tpu.dot_dimension_numbers<[1], [0], [0], [1], [0, 0, 1, 1], [], []>} : vector<8x32xf32>, vector<32x64xf32>, vector<8x64xf32> -> vector<8x64xf32>
    %c0_118 = arith.constant 0 : index
    %c0_119 = arith.constant 0 : index
    %337 = vector.load %arg13[%c0_118, %c0_119] : memref<1x64xf32, #tpu.memory_space<vmem>>, vector<1x64xf32>
    %338 = vector.broadcast %337 : vector<1x64xf32> to vector<8x64xf32>
    %339 = arith.addf %336, %338 : vector<8x64xf32>
    %cst_120 = arith.constant dense<0xFF800000> : vector<8xf32>
    %340 = vector.multi_reduction <maximumf>, %339, %cst_120 [1] : vector<8x64xf32> to vector<8xf32>
    %341 = vector.shape_cast %340 : vector<8xf32> to vector<8x1xf32>
    %342 = vector.broadcast %341 : vector<8x1xf32> to vector<8x64xf32>
    %343 = arith.subf %339, %342 : vector<8x64xf32>
    %344 = math.exp %343 : vector<8x64xf32>
    %cst_121 = arith.constant dense<0.000000e+00> : vector<8xf32>
    %345 = vector.multi_reduction <add>, %344, %cst_121 [1] : vector<8x64xf32> to vector<8xf32>
    %346 = vector.shape_cast %345 : vector<8xf32> to vector<8x1xf32>
    %347 = math.log %346 : vector<8x1xf32>
    %348 = arith.addf %347, %341 : vector<8x1xf32>
    %349 = vector.broadcast %348 : vector<8x1xf32> to vector<8x64xf32>
    %350 = arith.subf %339, %349 : vector<8x64xf32>
    %c0_122 = arith.constant 0 : index
    %c0_123 = arith.constant 0 : index
    %c0_124 = arith.constant 0 : index
    %351 = vector.load %arg14[%c0_122, %c0_123, %c0_124] : memref<2x8x64xf32, #tpu.memory_space<vmem>>, vector<1x8x64xf32>
    %352 = vector.shape_cast %351 : vector<1x8x64xf32> to vector<8x64xf32>
    %353 = vector.shape_cast %350 : vector<8x64xf32> to vector<1x8x64xf32>
    tpu.vector_store %arg14[%c0_122, %c0_123, %c0_124], %353 {strides = array<i32>} : memref<2x8x64xf32, #tpu.memory_space<vmem>>, vector<1x8x64xf32>,
    %c1_125 = arith.constant 1 : index
    %c0_126 = arith.constant 0 : index
    %c0_127 = arith.constant 0 : index
    %354 = vector.load %arg18[%c1_125, %c0_126, %c0_127] : memref<2x8x32xf32, #tpu.memory_space<vmem>>, vector<1x8x32xf32>
    %355 = vector.shape_cast %354 : vector<1x8x32xf32> to vector<8x32xf32>
    %c8 = arith.constant 8 : index
    %c0_128 = arith.constant 0 : index
    %356 = vector.load %arg6[%c8, %c0_128] : memref<16x32xf32, #tpu.memory_space<vmem>>, vector<8x32xf32>
    %357 = vector.extract_strided_slice %304 {offsets = [8, 0], sizes = [8, 32], strides = [1, 1]} : vector<16x32xf32> to vector<8x32xf32>
    %cst_129 = arith.constant dense<0.000000e+00> : vector<8x8xf32>
    %358 = tpu.matmul %355, %357, %cst_129 {dimension_numbers = #tpu.dot_dimension_numbers<[1], [1], [0], [0], [0, 0, 1, 0], [], []>} : vector<8x32xf32>, vector<8x32xf32>, vector<8x8xf32> -> vector<8x8xf32>
    %359 = math.exp %358 : vector<8x8xf32>
    %cst_130 = arith.constant dense<0xFF800000> : vector<8xf32>
    %360 = vector.multi_reduction <maximumf>, %359, %cst_130 [1] : vector<8x8xf32> to vector<8xf32>
    %361 = vector.shape_cast %360 : vector<8xf32> to vector<8x1xf32>
    %362 = vector.broadcast %361 : vector<8x1xf32> to vector<8x8xf32>
    %363 = arith.subf %359, %362 : vector<8x8xf32>
    %364 = math.exp %363 : vector<8x8xf32>
    %cst_131 = arith.constant dense<0.000000e+00> : vector<8xf32>
    %365 = vector.multi_reduction <add>, %364, %cst_131 [1] : vector<8x8xf32> to vector<8xf32>
    %366 = vector.shape_cast %365 : vector<8xf32> to vector<8x1xf32>
    %367 = math.log %366 : vector<8x1xf32>
    %368 = arith.addf %367, %361 : vector<8x1xf32>
    %369 = vector.broadcast %368 : vector<8x1xf32> to vector<8x8xf32>
    %370 = arith.subf %359, %369 : vector<8x8xf32>
    %c1_132 = arith.constant 1 : index
    %c0_133 = arith.constant 0 : index
    %c0_134 = arith.constant 0 : index
    %371 = vector.load %arg17[%c1_132, %c0_133, %c0_134] : memref<2x8x8xf32, #tpu.memory_space<vmem>>, vector<1x8x8xf32>
    %372 = vector.shape_cast %371 : vector<1x8x8xf32> to vector<8x8xf32>
    %373 = vector.shape_cast %370 : vector<8x8xf32> to vector<1x8x8xf32>
    tpu.vector_store %arg17[%c1_132, %c0_133, %c0_134], %373 {strides = array<i32>} : memref<2x8x8xf32, #tpu.memory_space<vmem>>, vector<1x8x8xf32>,
    %cst_135 = arith.constant dense<0.000000e+00> : vector<8x32xf32>
    %374 = tpu.matmul %370, %356, %cst_135 {dimension_numbers = #tpu.dot_dimension_numbers<[1], [0], [0], [1], [0, 0, 1, 1], [], []>} : vector<8x8xf32>, vector<8x32xf32>, vector<8x32xf32> -> vector<8x32xf32>
    %cst_136 = arith.constant dense<0.000000e+00> : vector<8x32xf32>
    %375 = tpu.matmul %355, %305, %cst_136 {dimension_numbers = #tpu.dot_dimension_numbers<[1], [0], [0], [1], [0, 0, 1, 1], [], []>} : vector<8x32xf32>, vector<32x32xf32>, vector<8x32xf32> -> vector<8x32xf32>
    %cst_137 = arith.constant dense<0.000000e+00> : vector<8x32xf32>
    %376 = tpu.matmul %374, %306, %cst_137 {dimension_numbers = #tpu.dot_dimension_numbers<[1], [0], [0], [1], [0, 0, 1, 1], [], []>} : vector<8x32xf32>, vector<32x32xf32>, vector<8x32xf32> -> vector<8x32xf32>
    %377 = arith.addf %375, %376 : vector<8x32xf32>
    %c0_138 = arith.constant 0 : index
    %c0_139 = arith.constant 0 : index
    %378 = vector.load %arg11[%c0_138, %c0_139] : memref<1x32xf32, #tpu.memory_space<vmem>>, vector<1x32xf32>
    %379 = vector.broadcast %378 : vector<1x32xf32> to vector<8x32xf32>
    %380 = arith.addf %377, %379 : vector<8x32xf32>
    %381 = math.tanh %380 : vector<8x32xf32>
    %cst_140 = arith.constant dense<0.000000e+00> : vector<8x64xf32>
    %382 = tpu.matmul %381, %307, %cst_140 {dimension_numbers = #tpu.dot_dimension_numbers<[1], [0], [0], [1], [0, 0, 1, 1], [], []>} : vector<8x32xf32>, vector<32x64xf32>, vector<8x64xf32> -> vector<8x64xf32>
    %c0_141 = arith.constant 0 : index
    %c0_142 = arith.constant 0 : index
    %383 = vector.load %arg13[%c0_141, %c0_142] : memref<1x64xf32, #tpu.memory_space<vmem>>, vector<1x64xf32>
    %384 = vector.broadcast %383 : vector<1x64xf32> to vector<8x64xf32>
    %385 = arith.addf %382, %384 : vector<8x64xf32>
    %cst_143 = arith.constant dense<0xFF800000> : vector<8xf32>
    %386 = vector.multi_reduction <maximumf>, %385, %cst_143 [1] : vector<8x64xf32> to vector<8xf32>
    %387 = vector.shape_cast %386 : vector<8xf32> to vector<8x1xf32>
    %388 = vector.broadcast %387 : vector<8x1xf32> to vector<8x64xf32>
    %389 = arith.subf %385, %388 : vector<8x64xf32>
    %390 = math.exp %389 : vector<8x64xf32>
    %cst_144 = arith.constant dense<0.000000e+00> : vector<8xf32>
    %391 = vector.multi_reduction <add>, %390, %cst_144 [1] : vector<8x64xf32> to vector<8xf32>
    %392 = vector.shape_cast %391 : vector<8xf32> to vector<8x1xf32>
    %393 = math.log %392 : vector<8x1xf32>
    %394 = arith.addf %393, %387 : vector<8x1xf32>
    %395 = vector.broadcast %394 : vector<8x1xf32> to vector<8x64xf32>
    %396 = arith.subf %385, %395 : vector<8x64xf32>
    %c1_145 = arith.constant 1 : index
    %c0_146 = arith.constant 0 : index
    %c0_147 = arith.constant 0 : index
    %397 = vector.load %arg14[%c1_145, %c0_146, %c0_147] : memref<2x8x64xf32, #tpu.memory_space<vmem>>, vector<1x8x64xf32>
    %398 = vector.shape_cast %397 : vector<1x8x64xf32> to vector<8x64xf32>
    %399 = vector.shape_cast %396 : vector<8x64xf32> to vector<1x8x64xf32>
    tpu.vector_store %arg14[%c1_145, %c0_146, %c0_147], %399 {strides = array<i32>} : memref<2x8x64xf32, #tpu.memory_space<vmem>>, vector<1x8x64xf32>,
    return
  }
}

</mosaic_0001>

<bundles_post_ra>
// kernel: decoder_atten_forward.1
= control target key start
LH: loop header
LB: loop body
LE: loop exit
PB: predicated region body
PF: predicated region fallthrough
CT: control target
= control target key end

     0   :  { %s1692_s0 = inlined_call_operand.vmem [shape: f32[16,32], index: 0, kind: input, shape index: {}]   ;;  %s1693_s1 = inlined_call_operand.vmem [shape: f32[2,32], index: 1, kind: input, shape index: {}]   ;;  %s1694_s2 = inlined_call_operand.vmem [shape: f32[2,32], index: 2, kind: input, shape index: {}]   ;;  %s1695_s3 = inlined_call_operand.vmem [shape: f32[32,128], index: 3, kind: input, shape index: {}]   ;;  %s1696_s4 = inlined_call_operand.vmem [shape: f32[32,128], index: 4, kind: input, shape index: {}]   ;;  %s1697_s5 = inlined_call_operand.vmem [shape: f32[1,128], index: 5, kind: input, shape index: {}]   ;;  %s1698_s6 = inlined_call_operand.vmem [shape: f32[16,32], index: 6, kind: input, shape index: {}]   ;;  %s1699_s7 = inlined_call_operand.vmem [shape: f32[32,32], index: 7, kind: input, shape index: {}]   ;;  %s1700_s8 = inlined_call_operand.vmem [shape: f32[1,32], index: 8, kind: input, shape index: {}]   ;;  %s1701_s9 = inlined_call_operand.vmem [shape: f32[32,32], index: 9, kind: input, shape index: {}]   ;;  %s1702_s10 = inlined_call_operand.vmem [shape: f32[32,32], index: 10, kind: input, shape index: {}]   ;;  %s1703_s11 = inlined_call_operand.vmem [shape: f32[1,32], index: 11, kind: input, shape index: {}]   ;;  %s1704_s12 = inlined_call_operand.vmem [shape: f32[32,64], index: 12, kind: input, shape index: {}]   ;;  %s1705_s13 = inlined_call_operand.vmem [shape: f32[1,64], index: 13, kind: input, shape index: {}]   ;;  %s1706_s14 = inlined_call_operand.vmem [shape: f32[2,8,64], index: 14, kind: output, shape index: {0}]   ;;  %s1707_s15 = inlined_call_operand.hbm [shape: f32[2,32], index: 15, kind: output, shape index: {1}]   ;;  %s1708_s16 = inlined_call_operand.hbm [shape: f32[2,32], index: 16, kind: output, shape index: {2}]   ;;  %s1709_s17 = inlined_call_operand.hbm [shape: f32[2,8,8], index: 17, kind: output, shape index: {3}]  }
   0x1   :  { %1711 = sst [smem:[#allocation10_spill]] %s1692_s0 }
   0x2   :  { %1712 = sst [smem:[#allocation11_spill]] %s1693_s1 }
   0x3   :  { %23 = vsyncpa [#allocation4], 0  ;;  %v58_v0 = vld [vmem:[%s1695_s3 + $0x18] sm:$0xff]  ;;  %v57_v1 = vld [vmem:[%s1695_s3 + $0x10] sm:$0xff]  ;;  %s1713_s25 = sld [smem:[#allocation10_spill]]  ;;  %vm63_vm0 = vcmask 261120  }
   0x4   :  { %v98_v2 = vld [vmem:[%s1696_s4 + $0x18] sm:$0xff]  ;;  %82 = vmatpush.msra.mxu0 %v58_v0  ;;  %v97_v3 = vld [vmem:[%s1696_s4 + $0x10] sm:$0xff]  ;;  %v56_v4 = vld [vmem:[%s1695_s3 + $0x8] sm:$0xff] }
   0x5   :  { %114 = vmatpush.msra.mxu1 %v98_v2  ;;  %v55_v5 = vld [vmem:[%s1695_s3] sm:$0xff]  ;;  %v96_v6 = vld [vmem:[%s1696_s4 + $0x8] sm:$0xff]  ;;  %187 = vmatpush.msra.mxu2 %v98_v2  ;;  %s1714_s3 = sld [smem:[#allocation11_spill]] }
   0x6   :  { %264 = vmatpush.msra.mxu3 %v98_v2  ;;  %83 = vmatpush.msra.mxu0 %v57_v1  ;;  %v95_v8 = vld [vmem:[%s1696_s4] sm:$0xff] }
   0x7   :  { %115 = vmatpush.msra.mxu1 %v97_v3  ;;  %188 = vmatpush.msra.mxu2 %v97_v3 }
   0x8   :  { %265 = vmatpush.msra.mxu3 %v97_v3  ;;  %84 = vmatpush.msra.mxu0 %v56_v4 }
   0x9   :  { %v53_v7 = vld [vmem:[%s1713_s25] sm:$0xff]  ;;  %116 = vmatpush.msra.mxu1 %v96_v6 }
   0xb   :  { %v93_v9 = vld [vmem:[%s1714_s3] sm:$0x3] }
   0xc   :  { %24 = vsyncpa [#allocation6], 0  ;;  %189 = vmatpush.msra.mxu2 %v96_v6  ;;  %266 = vmatpush.msra.mxu3 %v96_v6  ;;  %v1468_v10 = vld [vmem:[%s1697_s5] ss:$0 sm:$0xff]  ;;  %s1335_s30 = smov 64   ;;  %s1336_s1 = smov 32  }
   0xd   :  { %85 = vmatpush.msra.mxu0 %v55_v5  ;;  %117 = vmatpush.msra.mxu1 %v95_v8  ;;  %v94_v16 = vld [vmem:[%s1694_s2] sm:$0x3]  ;;  %vm168_vm5 = vcmask 253952   ;;  %vm171_vm6 = vcmask 254977   ;;  %s1337_s21 = smov 96   ;;  %s1091_s24 = sshll.u32 %s1708_s16, 4  ;;  %s1092_s24 = int_to_ptr.hbm [resolvable:$true] %s1091_s24 }
   0xe   :  { %1124 = vmatmul.msk.f32.vlgmr.msra.gmra.mxu0 %vm63_vm0, %v53_v7  ;;  %1126 = vmatmul.msk.f32.vlgmr.msra.gmra.mxu1 %vm63_vm0, %v93_v9  ;;  %s1080_s26 = sshll.u32 %s1707_s15, 4  ;;  %s1339_s27 = smov [#allocation3]   ;;  %s1081_s26 = int_to_ptr.hbm [resolvable:$true] %s1080_s26 }
   0xf   :  { %190 = vmatpush.msra.mxu2 %v95_v8  ;;  %267 = vmatpush.msra.mxu3 %v95_v8  ;;  %s1078_s28 = sshll.u32 %s1339_s27, 4  ;;  %s1340_s29 = smov [#allocation7]   ;;  %s1079_s28 = int_to_ptr.vmem [resolvable:$true] %s1078_s28 }
  0x10   :  { %341 = vmatpush.msrb.mxu1 %v98_v2  ;;  %562 = vmatpush.msrb.mxu0 %v98_v2  ;;  %s1101_s4 = sshll.u32 %s1709_s17, 4  ;;  %s1341_s16 = smov 128   ;;  %s1102_s4 = int_to_ptr.hbm [resolvable:$true] %s1101_s4 }
  0x11   :  { %418 = vmatpush.msrb.mxu2 %v98_v2  ;;  %487 = vmatpush.msrb.mxu3 %v98_v2  ;;  %s1342_s0 = smov 8  }
  0x12   :  { %342 = vmatpush.msrb.mxu1 %v97_v3  ;;  %563 = vmatpush.msrb.mxu0 %v97_v3 }
  0x13   :  { %419 = vmatpush.msrb.mxu2 %v97_v3  ;;  %488 = vmatpush.msrb.mxu3 %v97_v3 }
  0x14   :  { %343 = vmatpush.msrb.mxu1 %v96_v6  ;;  %564 = vmatpush.msrb.mxu0 %v96_v6 }
  0x15   :  { %420 = vmatpush.msrb.mxu2 %v96_v6  ;;  %489 = vmatpush.msrb.mxu3 %v96_v6 }
  0x16   :  { %344 = vmatpush.msrb.mxu1 %v95_v8  ;;  %565 = vmatpush.msrb.mxu0 %v95_v8 }
  0x17   :  { %421 = vmatpush.msrb.mxu2 %v95_v8  ;;  %490 = vmatpush.msrb.mxu3 %v95_v8 }
  0x18   :  { %637 = vmatpush.msra.mxu1 %v98_v2 }
  0x1a   :  { %638 = vmatpush.msra.mxu1 %v97_v3 }
  0x1c   :  { %639 = vmatpush.msra.mxu1 %v96_v6 }
  0x1e   :  { %640 = vmatpush.msra.mxu1 %v95_v8 }
  0x8b   :  { %v87_v11 = vpop.f32.mrf.mxu0  ;;  %v119_v12 = vpop.f32.mrf.mxu1 }
  0x8c   :  { %v1471_v13 = vadd.f32 %v1468_v10, %v87_v11 }
  0x8e   :  { %v122_v14 = vadd.f32 %v119_v12, %v1471_v13 }
  0x90   :  { %1171 = vtanh.f32 %v122_v14  ;;  %v1127_v17 = vmul.f32 -1.442695, %v122_v14 }
  0x92   :  { %1173 = vpow2.f32 %v1127_v17 }
  0x96   :  { %v1172_v15 = vpop.eup %1171 }
  0x97   :  { %149 = vrot.lane.b32.xlu0 %v1172_v15, %s1335_s30 }
  0x98   :  { %v1174_v18 = vpop.eup %1173 }
  0x99   :  { %v126_v19 = vadd.f32 1.0, %v1174_v18 }
  0x9b   :  { %1175 = vrcp.f32 %v126_v19  ;;  %v138_v25 = vand.u32 2147483648, %v126_v19  ;;  %vm132_vm2 = vweird.f32 %v126_v19  ;;  %v136_v26 = vand.u32 2147483647, %v126_v19 }
  0x9d   :  { %v139_v28 = vor.u32 1.1754944e-38, %v138_v25  ;;  %vm137_vm4 = vcmp.eq.f32.partialorder %v136_v26, 8.507059e+37 }
  0x9f   :  { %144 = vrot.lane.b32.xlu0 %v94_v16, %s1336_s1 }
  0xa1   :  { %v1176_v20 = vpop.eup %1175 }
  0xa2   :  { %v128_v21 = vmul.f32 %v1176_v20, %v126_v19  ;;  %vm133_vm1 = vweird.f32 %v1176_v20 }
  0xa3   :  { %vm134_vm3 = vmor %vm132_vm2, %vm133_vm1 }
  0xa4   :  { %v129_v22 = vsub.f32 1.0, %v128_v21 }
  0xa6   :  { %v130_v23 = vmul.f32 %v1176_v20, %v129_v22 }
  0xa8   :  { %v131_v24 = vadd.f32 %v1176_v20, %v130_v23 }
  0xaa   :  { %v135_v27 = vsel %vm134_vm3, %v1176_v20, %v131_v24 }
  0xab   :  { %v140_v30 = vsel %vm137_vm4, %v139_v28, %v135_v27 }
 0x109   :  { %v150_v29 = vpop.permute.xlu0 %149 }
 0x10a   :  { %v152_v31 = vmul.f32 %v150_v29, %v140_v30 }
 0x10c   :  { %154 = vrot.lane.b32.xlu1 %v152_v31, %s1336_s1 }
 0x111   :  { %v145_v32 = vpop.permute.xlu0 %144 }
 0x112   :  { %v147_v33 = vmul.f32 %v145_v32, %v140_v30 }
 0x17e   :  { %v155_v34 = vpop.permute.xlu1 %154 }
 0x17f   :  { %v157_v35 = vadd.f32 %v155_v34, %v147_v33 }
 0x181   :  { %1177 = vtanh.f32 %v157_v35  ;;  %v220_v59 = vrot.slane %v157_v35, 6 }
 0x187   :  { %v1178_v36 = vpop.eup %1177 }
 0x188   :  { %160 = vrot.lane.b32.xlu1 %v1178_v36, %s1335_s30 }
 0x1fa   :  { %v161_v37 = vpop.permute.xlu1 %160 }
 0x1fb   :  { %v163_v38 = vmul.f32 %v161_v37, %v140_v30 }
 0x1fd   :  { %165 = vrot.lane.b32.xlu2 %v163_v38, %s1336_s1 }
 0x257   :  { %v166_v39 = vpop.permute.xlu2 %165 }
 0x258   :  { %169 = vst.msk [vmem:[#allocation2] sm:$0x1] %vm168_vm5, %v166_v39  ;;  %1128 = vmatmul.msk.f32.vlgmr.msra.gmra.mxu2 %vm63_vm0, %v166_v39 }
 0x259   :  { %172 = vst.msk [vmem:[#allocation2 + $0x7] sm:$0x2] %vm171_vm6, %v166_v39 }
 0x2db   :  { %v192_v40 = vpop.f32.mrf.mxu2 }
 0x2dc   :  { %v196_v41 = vrot.slane %v192_v40, 6 }
 0x2de   :  { %v198_v42 = vadd.f32 %v196_v41, %v1471_v13 }
 0x2e0   :  { %1179 = vtanh.f32 %v198_v42  ;;  %v1129_v44 = vmul.f32 -1.442695, %v198_v42 }
 0x2e2   :  { %1181 = vpow2.f32 %v1129_v44 }
 0x2e6   :  { %v1180_v43 = vpop.eup %1179 }
 0x2e7   :  { %224 = vrot.lane.b32.xlu2 %v1180_v43, %s1335_s30 }
 0x2e8   :  { %v1182_v45 = vpop.eup %1181 }
 0x2e9   :  { %v202_v46 = vadd.f32 1.0, %v1182_v45 }
 0x2eb   :  { %1183 = vrcp.f32 %v202_v46  ;;  %v214_v52 = vand.u32 2147483648, %v202_v46  ;;  %vm208_vm8 = vweird.f32 %v202_v46  ;;  %v212_v53 = vand.u32 2147483647, %v202_v46 }
 0x2ed   :  { %v215_v55 = vor.u32 1.1754944e-38, %v214_v52  ;;  %vm213_vm10 = vcmp.eq.f32.partialorder %v212_v53, 8.507059e+37 }
 0x2f1   :  { %v1184_v47 = vpop.eup %1183 }
 0x2f2   :  { %v204_v48 = vmul.f32 %v1184_v47, %v202_v46  ;;  %vm209_vm7 = vweird.f32 %v1184_v47 }
 0x2f3   :  { %vm210_vm9 = vmor %vm208_vm8, %vm209_vm7 }
 0x2f4   :  { %v205_v49 = vsub.f32 1.0, %v204_v48 }
 0x2f6   :  { %v206_v50 = vmul.f32 %v1184_v47, %v205_v49 }
 0x2f8   :  { %v207_v51 = vadd.f32 %v1184_v47, %v206_v50 }
 0x2fa   :  { %v211_v54 = vsel %vm210_vm9, %v1184_v47, %v207_v51 }
 0x2fb   :  { %v216_v57 = vsel %vm213_vm10, %v215_v55, %v211_v54 }
 0x2fc   :  { %v222_v60 = vmul.f32 %v220_v59, %v216_v57 }
 0x341   :  { %v225_v56 = vpop.permute.xlu2 %224 }
 0x342   :  { %v227_v58 = vmul.f32 %v225_v56, %v216_v57 }
 0x344   :  { %229 = vrot.lane.b32.xlu0 %v227_v58, %s1336_s1 }
 0x3b6   :  { %v230_v61 = vpop.permute.xlu0 %229 }
 0x3b7   :  { %v232_v62 = vadd.f32 %v230_v61, %v222_v60  ;;  %v54_v60 = vld [vmem:[%s1713_s25 + $0x8] sm:$0xff] }
 0x3b8   :  { %1125 = vmatmul.msk.f32.gmra.mxu0 %vm63_vm0, %v54_v60 }
 0x3b9   :  { %1185 = vtanh.f32 %v232_v62  ;;  %v297_v25 = vrot.slane %v232_v62, 6 }
 0x3bf   :  { %v1186_v63 = vpop.eup %1185 }
 0x3c0   :  { %235 = vrot.lane.b32.xlu1 %v1186_v63, %s1335_s30 }
 0x432   :  { %v236_v0 = vpop.permute.xlu1 %235 }
 0x433   :  { %v1489_v1 = vmul.f32 %v236_v0, %v216_v57 }
 0x435   :  { %v247_v2 = vrot.slane %v1489_v1, 2  ;;  %v90_v62 = vpop.f32.mrf.mxu0 }
 0x436   :  { %v1517_v63 = vadd.f32 %v1468_v10, %v90_v62 }
 0x437   :  { %248 = vrot.lane.b32.xlu2 %v247_v2, %s1336_s1 }
 0x491   :  { %v249_v3 = vpop.permute.xlu2 %248 }
 0x492   :  { %1130 = vmatmul.msk.f32.vlgmr.msra.gmra.mxu3 %vm63_vm0, %v249_v3 }
 0x515   :  { %v269_v4 = vpop.f32.mrf.mxu3 }
 0x516   :  { %v273_v5 = vrot.slane %v269_v4, 4 }
 0x518   :  { %v275_v6 = vadd.f32 %v273_v5, %v1471_v13 }
 0x51a   :  { %1187 = vtanh.f32 %v275_v6  ;;  %v1131_v8 = vmul.f32 -1.442695, %v275_v6 }
 0x51c   :  { %1189 = vpow2.f32 %v1131_v8 }
 0x520   :  { %v1188_v7 = vpop.eup %1187 }
 0x521   :  { %301 = vrot.lane.b32.xlu0 %v1188_v7, %s1335_s30 }
 0x522   :  { %v1190_v9 = vpop.eup %1189 }
 0x523   :  { %v279_v11 = vadd.f32 1.0, %v1190_v9 }
 0x525   :  { %1191 = vrcp.f32 %v279_v11  ;;  %v291_v18 = vand.u32 2147483648, %v279_v11  ;;  %vm285_vm12 = vweird.f32 %v279_v11  ;;  %v289_v19 = vand.u32 2147483647, %v279_v11 }
 0x527   :  { %v292_v21 = vor.u32 1.1754944e-38, %v291_v18  ;;  %vm290_vm14 = vcmp.eq.f32.partialorder %v289_v19, 8.507059e+37 }
 0x52b   :  { %v1192_v12 = vpop.eup %1191 }
 0x52c   :  { %v281_v14 = vmul.f32 %v1192_v12, %v279_v11  ;;  %vm286_vm11 = vweird.f32 %v1192_v12 }
 0x52d   :  { %vm287_vm13 = vmor %vm285_vm12, %vm286_vm11 }
 0x52e   :  { %v282_v15 = vsub.f32 1.0, %v281_v14 }
 0x530   :  { %v283_v16 = vmul.f32 %v1192_v12, %v282_v15 }
 0x532   :  { %v284_v17 = vadd.f32 %v1192_v12, %v283_v16 }
 0x534   :  { %v288_v20 = vsel %vm287_vm13, %v1192_v12, %v284_v17 }
 0x535   :  { %v293_v23 = vsel %vm290_vm14, %v292_v21, %v288_v20 }
 0x536   :  { %v299_v26 = vmul.f32 %v297_v25, %v293_v23 }
 0x593   :  { %v302_v22 = vpop.permute.xlu0 %301 }
 0x594   :  { %v304_v24 = vmul.f32 %v302_v22, %v293_v23 }
 0x596   :  { %306 = vrot.lane.b32.xlu1 %v304_v24, %s1336_s1 }
 0x608   :  { %v307_v27 = vpop.permute.xlu1 %306 }
 0x609   :  { %v309_v28 = vadd.f32 %v307_v27, %v299_v26 }
 0x60b   :  { %1193 = vtanh.f32 %v309_v28  ;;  %v374_v52 = vrot.slane %v309_v28, 6 }
 0x611   :  { %v1194_v29 = vpop.eup %1193 }
 0x612   :  { %312 = vrot.lane.b32.xlu2 %v1194_v29, %s1335_s30 }
 0x66c   :  { %v313_v30 = vpop.permute.xlu2 %312 }
 0x66d   :  { %v1498_v31 = vmul.f32 %v313_v30, %v293_v23 }
 0x66f   :  { %v324_v32 = vrot.slane %v1498_v31, 4 }
 0x671   :  { %325 = vrot.lane.b32.xlu0 %v324_v32, %s1336_s1 }
 0x6e3   :  { %v326_v33 = vpop.permute.xlu0 %325 }
 0x6e4   :  { %1132 = vmatmul.msk.f32.vlgmr.msrb.gmra.mxu1 %vm63_vm0, %v326_v33 }
 0x761   :  { %v346_v34 = vpop.f32.mrf.mxu1 }
 0x762   :  { %v350_v35 = vrot.slane %v346_v34, 2 }
 0x764   :  { %v352_v36 = vadd.f32 %v350_v35, %v1471_v13 }
 0x766   :  { %1195 = vtanh.f32 %v352_v36  ;;  %v1133_v38 = vmul.f32 -1.442695, %v352_v36 }
 0x768   :  { %1197 = vpow2.f32 %v1133_v38 }
 0x76c   :  { %v1196_v37 = vpop.eup %1195 }
 0x76d   :  { %378 = vrot.lane.b32.xlu1 %v1196_v37, %s1335_s30 }
 0x76e   :  { %v1198_v39 = vpop.eup %1197 }
 0x76f   :  { %v356_v40 = vadd.f32 1.0, %v1198_v39 }
 0x771   :  { %1199 = vrcp.f32 %v356_v40  ;;  %v368_v46 = vand.u32 2147483648, %v356_v40  ;;  %vm362_vm1 = vweird.f32 %v356_v40  ;;  %v366_v47 = vand.u32 2147483647, %v356_v40 }
 0x773   :  { %v369_v48 = vor.u32 1.1754944e-38, %v368_v46  ;;  %vm367_vm3 = vcmp.eq.f32.partialorder %v366_v47, 8.507059e+37 }
 0x777   :  { %v1200_v41 = vpop.eup %1199 }
 0x778   :  { %v358_v42 = vmul.f32 %v1200_v41, %v356_v40  ;;  %vm363_vm15 = vweird.f32 %v1200_v41 }
 0x779   :  { %vm364_vm2 = vmor %vm362_vm1, %vm363_vm15 }
 0x77a   :  { %v359_v43 = vsub.f32 1.0, %v358_v42 }
 0x77c   :  { %v360_v44 = vmul.f32 %v1200_v41, %v359_v43 }
 0x77e   :  { %v361_v45 = vadd.f32 %v1200_v41, %v360_v44 }
 0x780   :  { %v365_v13 = vsel %vm364_vm2, %v1200_v41, %v361_v45 }
 0x781   :  { %v370_v50 = vsel %vm367_vm3, %v369_v48, %v365_v13 }
 0x782   :  { %v376_v53 = vmul.f32 %v374_v52, %v370_v50 }
 0x7df   :  { %v379_v49 = vpop.permute.xlu1 %378 }
 0x7e0   :  { %v381_v51 = vmul.f32 %v379_v49, %v370_v50 }
 0x7e2   :  { %383 = vrot.lane.b32.xlu2 %v381_v51, %s1336_s1 }
 0x83c   :  { %v384_v54 = vpop.permute.xlu2 %383 }
 0x83d   :  { %v386_v55 = vadd.f32 %v384_v54, %v376_v53 }
 0x83f   :  { %1201 = vtanh.f32 %v386_v55  ;;  %v448_v20 = vrot.slane %v386_v55, 6 }
 0x845   :  { %v1202_v56 = vpop.eup %1201 }
 0x846   :  { %389 = vrot.lane.b32.xlu0 %v1202_v56, %s1335_s30 }
 0x8b8   :  { %v390_v57 = vpop.permute.xlu0 %389 }
 0x8b9   :  { %v1507_v58 = vmul.f32 %v390_v57, %v370_v50 }
 0x8bb   :  { %v401_v59 = vrot.slane %v1507_v58, 6 }
 0x8bd   :  { %402 = vrot.lane.b32.xlu1 %v401_v59, %s1336_s1 }
 0x92f   :  { %v403_v61 = vpop.permute.xlu1 %402 }
 0x930   :  { %1134 = vmatmul.msk.f32.vlgmr.msrb.gmra.mxu2 %vm63_vm0, %v403_v61 }
 0x9b3   :  { %v423_v0 = vpop.f32.mrf.mxu2 }
 0x9b4   :  { %v426_v2 = vadd.f32 %v423_v0, %v1517_v63 }
 0x9b6   :  { %1203 = vtanh.f32 %v426_v2  ;;  %v1135_v4 = vmul.f32 -1.442695, %v426_v2 }
 0x9b8   :  { %1205 = vpow2.f32 %v1135_v4 }
 0x9bc   :  { %v1204_v3 = vpop.eup %1203 }
 0x9bd   :  { %452 = vrot.lane.b32.xlu2 %v1204_v3, %s1335_s30 }
 0x9be   :  { %v1206_v5 = vpop.eup %1205 }
 0x9bf   :  { %v430_v6 = vadd.f32 1.0, %v1206_v5 }
 0x9c1   :  { %1207 = vrcp.f32 %v430_v6  ;;  %v442_v10 = vand.u32 2147483648, %v430_v6  ;;  %vm436_vm7 = vweird.f32 %v430_v6  ;;  %v440_v14 = vand.u32 2147483647, %v430_v6 }
 0x9c3   :  { %v443_v16 = vor.u32 1.1754944e-38, %v442_v10  ;;  %vm441_vm9 = vcmp.eq.f32.partialorder %v440_v14, 8.507059e+37 }
 0x9c7   :  { %v1208_v7 = vpop.eup %1207 }
 0x9c8   :  { %v432_v8 = vmul.f32 %v1208_v7, %v430_v6  ;;  %vm437_vm4 = vweird.f32 %v1208_v7 }
 0x9c9   :  { %vm438_vm8 = vmor %vm436_vm7, %vm437_vm4  ;;  %vm243_vm7 = vcmask 256002  }
 0x9ca   :  { %v433_v9 = vsub.f32 1.0, %v432_v8 }
 0x9cc   :  { %v434_v11 = vmul.f32 %v1208_v7, %v433_v9 }
 0x9ce   :  { %v435_v12 = vadd.f32 %v1208_v7, %v434_v11 }
 0x9d0   :  { %v439_v15 = vsel %vm438_vm8, %v1208_v7, %v435_v12  ;;  %vm245_vm8 = vcmask 257027  }
 0x9d1   :  { %v444_v18 = vsel %vm441_vm9, %v443_v16, %v439_v15  ;;  %vm320_vm9 = vcmask 258052  }
 0x9d2   :  { %v450_v21 = vmul.f32 %v448_v20, %v444_v18 }
 0xa17   :  { %v453_v17 = vpop.permute.xlu2 %452 }
 0xa18   :  { %v455_v19 = vmul.f32 %v453_v17, %v444_v18 }
 0xa1a   :  { %457 = vrot.lane.b32.xlu0 %v455_v19, %s1336_s1 }
 0xa8c   :  { %v458_v22 = vpop.permute.xlu0 %457 }
 0xa8d   :  { %v460_v23 = vadd.f32 %v458_v22, %v450_v21 }
 0xa8f   :  { %1209 = vtanh.f32 %v460_v23  ;;  %v520_v13 = vrot.slane %v460_v23, 6 }
 0xa95   :  { %v1210_v24 = vpop.eup %1209 }
 0xa96   :  { %463 = vrot.lane.b32.xlu1 %v1210_v24, %s1335_s30 }
 0xb08   :  { %v464_v25 = vpop.permute.xlu1 %463 }
 0xb09   :  { %v466_v26 = vmul.f32 %v464_v25, %v444_v18 }
 0xb0b   :  { %468 = vrot.lane.b32.xlu2 %v466_v26, %s1336_s1 }
 0xb65   :  { %v469_v27 = vpop.permute.xlu2 %468 }
 0xb66   :  { %471 = vst.msk [vmem:[#allocation2 + $0x4] sm:$0x1] %vm168_vm5, %v469_v27  ;;  %1136 = vmatmul.msk.f32.vlgmr.msrb.gmra.mxu3 %vm63_vm0, %v469_v27 }
 0xb67   :  { %472 = vst.msk [vmem:[#allocation2 + $0xb] sm:$0x2] %vm171_vm6, %v469_v27 }
 0xbe9   :  { %v492_v28 = vpop.f32.mrf.mxu3 }
 0xbea   :  { %v496_v29 = vrot.slane %v492_v28, 6 }
 0xbec   :  { %v498_v30 = vadd.f32 %v496_v29, %v1517_v63 }
 0xbee   :  { %1211 = vtanh.f32 %v498_v30  ;;  %v1137_v33 = vmul.f32 -1.442695, %v498_v30 }
 0xbf0   :  { %1213 = vpow2.f32 %v1137_v33 }
 0xbf4   :  { %v1212_v32 = vpop.eup %1211 }
 0xbf5   :  { %524 = vrot.lane.b32.xlu0 %v1212_v32, %s1335_s30 }
 0xbf6   :  { %v1214_v34 = vpop.eup %1213 }
 0xbf7   :  { %v502_v35 = vadd.f32 1.0, %v1214_v34 }
 0xbf9   :  { %1215 = vrcp.f32 %v502_v35  ;;  %v514_v41 = vand.u32 2147483648, %v502_v35  ;;  %vm508_vm6 = vweird.f32 %v502_v35  ;;  %v512_v42 = vand.u32 2147483647, %v502_v35 }
 0xbfb   :  { %v515_v44 = vor.u32 1.1754944e-38, %v514_v41  ;;  %vm513_vm11 = vcmp.eq.f32.partialorder %v512_v42, 8.507059e+37 }
 0xbff   :  { %v1216_v36 = vpop.eup %1215 }
 0xc00   :  { %v504_v37 = vmul.f32 %v1216_v36, %v502_v35  ;;  %vm509_vm5 = vweird.f32 %v1216_v36 }
 0xc01   :  { %vm510_vm10 = vmor %vm508_vm6, %vm509_vm5  ;;  %vm322_vm5 = vcmask 259077   ;;  %vm397_vm6 = vcmask 260102  }
 0xc02   :  { %v505_v38 = vsub.f32 1.0, %v504_v37 }
 0xc04   :  { %v506_v39 = vmul.f32 %v1216_v36, %v505_v38 }
 0xc06   :  { %v507_v40 = vadd.f32 %v1216_v36, %v506_v39 }
 0xc08   :  { %v511_v43 = vsel %vm510_vm10, %v1216_v36, %v507_v40  ;;  %vm399_vm10 = vcmask 261127  }
 0xc09   :  { %v516_v46 = vsel %vm513_vm11, %v515_v44, %v511_v43  ;;  %v707_v44 = vld [vmem:[%s1699_s7 + $0x18] sm:$0xff]  ;;  %vm695_vm11 = vcmask 261126  }
 0xc0a   :  { %v522_v48 = vmul.f32 %v520_v13, %v516_v46  ;;  %730 = vmatpush.msra.mxu2 %v707_v44 }
 0xc67   :  { %v525_v45 = vpop.permute.xlu0 %524 }
 0xc68   :  { %v527_v47 = vmul.f32 %v525_v45, %v516_v46  ;;  %v706_v45 = vld [vmem:[%s1699_s7 + $0x10] sm:$0xff] }
 0xc69   :  { %731 = vmatpush.msra.mxu2 %v706_v45  ;;  %v1168_v45 = vld [vmem:[%s1705_s13] ss:$0 sm:$0xff] }
 0xc6a   :  { %529 = vrot.lane.b32.xlu1 %v527_v47, %s1336_s1  ;;  %v704_v47 = vld [vmem:[%s1699_s7] sm:$0xff] }
 0xcdc   :  { %v530_v49 = vpop.permute.xlu1 %529 }
 0xcdd   :  { %v532_v50 = vadd.f32 %v530_v49, %v522_v48 }
 0xcdf   :  { %1217 = vtanh.f32 %v532_v50  ;;  %v595_v15 = vrot.slane %v532_v50, 6 }
 0xce5   :  { %v1218_v51 = vpop.eup %1217 }
 0xce6   :  { %535 = vrot.lane.b32.xlu2 %v1218_v51, %s1335_s30 }
 0xd40   :  { %v536_v52 = vpop.permute.xlu2 %535 }
 0xd41   :  { %v538_v53 = vmul.f32 %v536_v52, %v516_v46  ;;  %v702_v46 = vld [vmem:[%s1698_s6] sm:$0xff] }
 0xd42   :  { %816 = vmatpush.msra.mxu0 %v702_v46 }
 0xd43   :  { %v545_v54 = vrot.slane %v538_v53, 2 }
 0xd45   :  { %546 = vrot.lane.b32.xlu0 %v545_v54, %s1336_s1  ;;  %v1577_v54 = vld [vmem:[%s1700_s8] ss:$0 sm:$0xff] }
 0xdb7   :  { %v547_v55 = vpop.permute.xlu0 %546 }
 0xdb8   :  { %1138 = vmatmul.msk.f32.vlgmr.msrb.gmra.mxu0 %vm63_vm0, %v547_v55 }
 0xe35   :  { %v567_v56 = vpop.f32.mrf.mxu0 }
 0xe36   :  { %v571_v57 = vrot.slane %v567_v56, 4 }
 0xe38   :  { %v573_v59 = vadd.f32 %v571_v57, %v1517_v63 }
 0xe3a   :  { %1219 = vtanh.f32 %v573_v59  ;;  %v1139_v61 = vmul.f32 -1.442695, %v573_v59 }
 0xe3c   :  { %1221 = vpow2.f32 %v1139_v61  ;;  %v1590_v61 = vld [vmem:[%s1701_s9 + $0x10] sm:$0xff] }
 0xe40   :  { %v1220_v60 = vpop.eup %1219 }
 0xe41   :  { %599 = vrot.lane.b32.xlu1 %v1220_v60, %s1335_s30 }
 0xe42   :  { %v1222_v62 = vpop.eup %1221 }
 0xe43   :  { %v577_v0 = vadd.f32 1.0, %v1222_v62  ;;  %v1596_v62 = vld [vmem:[%s1701_s9 + $0x8] sm:$0xff] }
 0xe45   :  { %1223 = vrcp.f32 %v577_v0  ;;  %v589_v7 = vand.u32 2147483648, %v577_v0  ;;  %vm583_vm13 = vweird.f32 %v577_v0  ;;  %v587_v8 = vand.u32 2147483647, %v577_v0 }
 0xe47   :  { %v590_v11 = vor.u32 1.1754944e-38, %v589_v7  ;;  %vm588_vm15 = vcmp.eq.f32.partialorder %v587_v8, 8.507059e+37 }
 0xe4b   :  { %v1224_v2 = vpop.eup %1223 }
 0xe4c   :  { %v579_v3 = vmul.f32 %v1224_v2, %v577_v0  ;;  %vm584_vm12 = vweird.f32 %v1224_v2  ;;  %v1602_v0 = vld [vmem:[%s1701_s9] sm:$0xff] }
 0xe4d   :  { %vm585_vm14 = vmor %vm583_vm13, %vm584_vm12  ;;  %vm783_vm12 = vcmask 64512   ;;  %vm897_vm13 = vcmask 523264  }
 0xe4e   :  { %v580_v4 = vsub.f32 1.0, %v579_v3 }
 0xe50   :  { %v581_v5 = vmul.f32 %v1224_v2, %v580_v4 }
 0xe52   :  { %v582_v6 = vadd.f32 %v1224_v2, %v581_v5 }
 0xe54   :  { %v586_v9 = vsel %vm585_vm14, %v1224_v2, %v582_v6 }
 0xe55   :  { %v591_v10 = vsel %vm588_vm15, %v590_v11, %v586_v9 }
 0xe56   :  { %v597_v16 = vmul.f32 %v595_v15, %v591_v10  ;;  %v748_v15 = vld [vmem:[%s1702_s10 + $0x18] sm:$0xff] }
 0xe57   :  { %836 = vmatpush.msrb.mxu1 %v748_v15 }
 0xeb3   :  { %v600_v12 = vpop.permute.xlu1 %599 }
 0xeb4   :  { %v602_v14 = vmul.f32 %v600_v12, %v591_v10 }
 0xeb6   :  { %604 = vrot.lane.b32.xlu2 %v602_v14, %s1336_s1  ;;  %v703_v14 = vld [vmem:[%s1698_s6 + $0x8] sm:$0xff] }
 0xf10   :  { %v605_v17 = vpop.permute.xlu2 %604 }
 0xf11   :  { %v1536_v18 = vadd.f32 %v605_v17, %v597_v16  ;;  %v747_v16 = vld [vmem:[%s1702_s10 + $0x10] sm:$0xff]  ;;  %v746_v17 = vld [vmem:[%s1702_s10 + $0x8] sm:$0xff] }
 0xf12   :  { %837 = vmatpush.msrb.mxu1 %v747_v16 }
 0xf13   :  { %1225 = vtanh.f32 %v1536_v18  ;;  %v670_v13 = vrot.slane %v1536_v18, 6 }
 0xf14   :  { %838 = vmatpush.msrb.mxu1 %v746_v17 }
 0xf19   :  { %v1226_v19 = vpop.eup %1225 }
 0xf1a   :  { %610 = vrot.lane.b32.xlu0 %v1226_v19, %s1335_s30 }
 0xf8c   :  { %v611_v20 = vpop.permute.xlu0 %610 }
 0xf8d   :  { %v613_v21 = vmul.f32 %v611_v20, %v591_v10 }
 0xf8f   :  { %v620_v22 = vrot.slane %v613_v21, 4 }
 0xf91   :  { %621 = vrot.lane.b32.xlu1 %v620_v22, %s1336_s1 }
0x1003   :  { %v622_v23 = vpop.permute.xlu1 %621 }
0x1004   :  { %1140 = vmatmul.msk.f32.vlgmr.msra.gmra.mxu1 %vm63_vm0, %v622_v23  ;;  %v745_v23 = vld [vmem:[%s1702_s10] sm:$0xff] }
0x1005   :  { %839 = vmatpush.msrb.mxu1 %v745_v23 }
0x1081   :  { %v642_v24 = vpop.f32.mrf.mxu1 }
0x1082   :  { %v646_v25 = vrot.slane %v642_v24, 2 }
0x1084   :  { %v648_v26 = vadd.f32 %v646_v25, %v1517_v63 }
0x1086   :  { %1227 = vtanh.f32 %v648_v26  ;;  %v1141_v28 = vmul.f32 -1.442695, %v648_v26 }
0x1088   :  { %1229 = vpow2.f32 %v1141_v28  ;;  %v752_v28 = vld [vmem:[%s1704_s12 + $0x18] sm:$0xff] }
0x1089   :  { %889 = vmatpush.msrb.mxu0 %v752_v28 }
0x108c   :  { %v1228_v27 = vpop.eup %1227 }
0x108d   :  { %674 = vrot.lane.b32.xlu2 %v1228_v27, %s1335_s30 }
0x108e   :  { %v1230_v29 = vpop.eup %1229 }
0x108f   :  { %v652_v30 = vadd.f32 1.0, %v1230_v29  ;;  %v751_v29 = vld [vmem:[%s1704_s12 + $0x10] sm:$0xff] }
0x1090   :  { %890 = vmatpush.msrb.mxu0 %v751_v29 }
0x1091   :  { %1231 = vrcp.f32 %v652_v30  ;;  %v664_v63 = vand.u32 2147483648, %v652_v30  ;;  %vm658_vm2 = vweird.f32 %v652_v30  ;;  %v662_v37 = vand.u32 2147483647, %v652_v30 }
0x1093   :  { %v665_v39 = vor.u32 1.1754944e-38, %v664_v63  ;;  %vm663_vm4 = vcmp.eq.f32.partialorder %v662_v37, 8.507059e+37 }
0x1095   :  { %240 = vrot.lane.b32.xlu2 %v1489_v1, %s1336_s1 }
0x1097   :  { %v1232_v32 = vpop.eup %1231 }
0x1098   :  { %v654_v33 = vmul.f32 %v1232_v32, %v652_v30  ;;  %vm659_vm1 = vweird.f32 %v1232_v32  ;;  %v750_v30 = vld [vmem:[%s1704_s12 + $0x8] sm:$0xff] }
0x1099   :  { %vm660_vm3 = vmor %vm658_vm2, %vm659_vm1  ;;  %891 = vmatpush.msrb.mxu0 %v750_v30 }
0x109a   :  { %v655_v34 = vsub.f32 1.0, %v654_v33  ;;  %v1167_v33 = vld [vmem:[%s1703_s11] ss:$0 sm:$0xff] }
0x109c   :  { %v656_v35 = vmul.f32 %v1232_v32, %v655_v34 }
0x109d   :  { %540 = vrot.lane.b32.xlu2 %v538_v53, %s1336_s1 }
0x109e   :  { %v657_v36 = vadd.f32 %v1232_v32, %v656_v35 }
0x10a0   :  { %v661_v38 = vsel %vm660_vm3, %v1232_v32, %v657_v36  ;;  %v749_v32 = vld [vmem:[%s1704_s12] sm:$0xff] }
0x10a1   :  { %v666_v40 = vsel %vm663_vm4, %v665_v39, %v661_v38  ;;  %892 = vmatpush.msrb.mxu0 %v749_v32 }
0x10a2   :  { %v672_v48 = vmul.f32 %v670_v13, %v666_v40 }
0x10e7   :  { %v675_v1 = vpop.permute.xlu2 %674 }
0x10e8   :  { %v677_v41 = vmul.f32 %v675_v1, %v666_v40 }
0x10ea   :  { %679 = vrot.lane.b32.xlu0 %v677_v41, %s1336_s1 }
0x10ef   :  { %v241_v42 = vpop.permute.xlu2 %240 }
0x10f0   :  { %244 = vst.msk [vmem:[#allocation2 - $0x1] sm:$0x4] %vm243_vm7, %v241_v42 }
0x10f1   :  { %246 = vst.msk [vmem:[#allocation2 + $0x6] sm:$0x8] %vm245_vm8, %v241_v42 }
0x10f2   :  { %317 = vrot.lane.b32.xlu0 %v1498_v31, %s1336_s1  ;;  %v705_v31 = vld [vmem:[%s1699_s7 + $0x8] sm:$0xff]  ;;  %s1099_s7 = sshll.u32 %s1340_s29, 4  ;;  %s1100_s7 = int_to_ptr.vmem [resolvable:$true] %s1099_s7 }
0x10f3   :  { %732 = vmatpush.msra.mxu2 %v705_v31 }
0x10f5   :  { %733 = vmatpush.msra.mxu2 %v704_v47 }
0x10f6   :  { %1142 = vmatmul.msk.f32.vlgmr.msra.gmra.mxu2 %vm63_vm0, %v702_v46 }
0x10f7   :  { %v541_v43 = vpop.permute.xlu2 %540  ;;  %975 = vmatpush.msrb.mxu2 %v703_v14 }
0x10f8   :  { %543 = vst.msk [vmem:[#allocation2 + $0x3] sm:$0x4] %vm243_vm7, %v541_v43 }
0x10f9   :  { %544 = vst.msk [vmem:[#allocation2 + $0xa] sm:$0x8] %vm245_vm8, %v541_v43 }
0x10fa   :  { %615 = vrot.lane.b32.xlu0 %v613_v21, %s1336_s1 }
0x10fe   :  { %1143 = vmatmul.msk.f32.gmra.mxu2 %vm63_vm0, %v703_v14 }
0x115c   :  { %v680_v49 = vpop.permute.xlu0 %679 }
0x115d   :  { %v1568_v50 = vadd.f32 %v680_v49, %v672_v48 }
0x115f   :  { %1233 = vtanh.f32 %v1568_v50 }
0x1164   :  { %v318_v51 = vpop.permute.xlu0 %317 }
0x1165   :  { %v1234_v52 = vpop.eup %1233  ;;  %321 = vst.msk [vmem:[#allocation2 - $0x2] sm:$0x10] %vm320_vm9, %v318_v51 }
0x1166   :  { %323 = vst.msk [vmem:[#allocation2 + $0x5] sm:$0x20] %vm322_vm5, %v318_v51  ;;  %685 = vrot.lane.b32.xlu1 %v1234_v52, %s1335_s30 }
0x116c   :  { %v616_v53 = vpop.permute.xlu0 %615 }
0x116d   :  { %618 = vst.msk [vmem:[#allocation2 + $0x2] sm:$0x10] %vm320_vm9, %v616_v53 }
0x116e   :  { %619 = vst.msk [vmem:[#allocation2 + $0x9] sm:$0x20] %vm322_vm5, %v616_v53  ;;  %394 = vrot.lane.b32.xlu1 %v1507_v58, %s1336_s1  ;;  %v1585_v58 = vld [vmem:[%s1701_s9 + $0x18] sm:$0xff] }
0x1179   :  { %v735_v57 = vpop.f32.mrf.mxu2 }
0x117a   :  { %v736_v59 = vadd.f32 %v1577_v54, %v735_v57 }
0x117c   :  { %1144 = vmatpush.xpose.msk.msra.mxu3 %vm63_vm0, %v736_v59 }
0x1180   :  { %856 = vmatpush.msrb.mxu3 %v1585_v58 }
0x1181   :  { %v738_v24 = vpop.f32.mrf.mxu2 }
0x1182   :  { %857 = vmatpush.msrb.mxu3 %v1590_v61  ;;  %v739_v25 = vadd.f32 %v1577_v54, %v738_v24 }
0x1184   :  { %858 = vmatpush.msrb.mxu3 %v1596_v62  ;;  %1150 = vmatpush.xpose.msk.msra.mxu1 %vm63_vm0, %v739_v25 }
0x1186   :  { %859 = vmatpush.msrb.mxu3 %v1602_v0 }
0x11d8   :  { %v686_v55 = vpop.permute.xlu1 %685 }
0x11d9   :  { %v688_v56 = vmul.f32 %v686_v55, %v666_v40 }
0x11db   :  { %690 = vrot.lane.b32.xlu1 %v688_v56, %s1336_s1 }
0x11e0   :  { %v395_v60 = vpop.permute.xlu1 %394 }
0x11e1   :  { %398 = vst.msk [vmem:[#allocation2 - $0x3] sm:$0x40] %vm397_vm6, %v395_v60 }
0x11e2   :  { %400 = vst.msk [vmem:[#allocation2 + $0x4] sm:$0x80] %vm399_vm10, %v395_v60 }
0x124d   :  { %v691_v2 = vpop.permute.xlu1 %690 }
0x124e   :  { %693 = vst.msk [vmem:[#allocation2 + $0x1] sm:$0x40] %vm397_vm6, %v691_v2 }
0x124f   :  { %694 = vst.msk [vmem:[#allocation2 + $0x8] sm:$0x80] %vm399_vm10, %v691_v2 }
0x1250   :  { %696 = vst.msk [vmem:[#allocation3 - $0x6] sm:$0xc0] %vm695_vm11, %v691_v2 }
0x1251   :  { %1083 = dma.vmem_to_hbm [thread:$0]  %s1079_s28, 32, %s1081_s26, [#allocation4]  }
0x1255   :  { %v753_v3 = vld [vmem:[#allocation2] sm:$0xff] }
0x1256   :  { %1145 = vmatmul.msk.f32.vlgmr.msra.gmra.mxu3 %vm63_vm0, %v753_v3  ;;  %v912_v27 = vld [vmem:[#allocation2 + $0x8] sm:$0xff] }
0x1257   :  { %995 = vmatpush.msra.mxu3 %v748_v15 }
0x1259   :  { %996 = vmatpush.msra.mxu3 %v747_v16 }
0x125b   :  { %997 = vmatpush.msra.mxu3 %v746_v17 }
0x125d   :  { %998 = vmatpush.msra.mxu3 %v745_v23 }
0x125e   :  { %1148 = vmatmul.msk.f32.vlgmr.msrb.gmra.mxu3 %vm63_vm0, %v753_v3  ;;  %v1169_v3 = vld [vmem:[%s1703_s11] ss:$0 sm:$0xff]  ;;  %s1338_s11 = smov [#allocation5]  }
0x125f   :  { %s1089_s22 = sshll.u32 %s1338_s11, 4  ;;  %s1090_s22 = int_to_ptr.vmem [resolvable:$true] %s1089_s22 }
0x12d9   :  { %v778_v4 = vpop.f32.mrf.mxu3 }
0x12da   :  { %v781_v5 = vmul.f32 1.442695, %v778_v4 }
0x12dc   :  { %1235 = vpow2.f32 %v781_v5 }
0x12e1   :  { %v861_v34 = vpop.f32.mrf.mxu3 }
0x12e2   :  { %v1236_v6 = vpop.eup %1235 }
0x12e3   :  { %v784_v7 = vsel %vm783_vm12, %v1236_v6, -inf }
0x12e4   :  { %785 = vmax.xlane.f32.xlu2 %v784_v7 }
0x1357   :  { %v786_v8 = vpop.xlane.xlu2 %785 }
0x1358   :  { %v787_v9 = vsub.f32 %v1236_v6, %v786_v8 }
0x135a   :  { %v788_v11 = vmul.f32 1.442695, %v787_v9  ;;  %v1170_v9 = vld [vmem:[%s1705_s13] ss:$0 sm:$0xff] }
0x135c   :  { %1237 = vpow2.f32 %v788_v11 }
0x1362   :  { %v1238_v12 = vpop.eup %1237 }
0x1363   :  { %v790_v10 = vsel %vm783_vm12, %v1238_v12, 0.0 }
0x1364   :  { %791 = vadd.xlane.f32.xlu0 %v790_v10 }
0x13d7   :  { %v792_v18 = vpop.xlane.xlu0 %791 }
0x13d8   :  { %1239 = vlog2.f32 %v792_v18 }
0x13de   :  { %v1240_v19 = vpop.eup %1239 }
0x13df   :  { %v794_v20 = vmul.f32 0.6931472, %v1240_v19 }
0x13e1   :  { %v795_v21 = vadd.f32 %v794_v20, %v786_v8 }
0x13e3   :  { %v796_v22 = vsub.f32 %v1236_v6, %v795_v21 }
0x13e5   :  { %797 = vst.msk [vmem:[#allocation7] sm:$0xff] %vm783_vm12, %v796_v22  ;;  %1146 = vmatmul.msk.f32.vlgmr.msra.gmra.mxu0 %vm783_vm12, %v796_v22 }
0x13e6   :  { %1015 = vmatpush.msra.mxu0 %v1585_v58 }
0x13e8   :  { %1016 = vmatpush.msra.mxu0 %v1590_v61 }
0x13ea   :  { %1017 = vmatpush.msra.mxu0 %v1596_v62 }
0x13ec   :  { %1018 = vmatpush.msra.mxu0 %v1602_v0 }
0x1462   :  { %v818_v26 = vpop.f32.mrf.mxu0 }
0x1463   :  { %1147 = vmatmul.msk.f32.vlgmr.msrb.gmra.mxu1 %vm63_vm0, %v818_v26 }
0x1464   :  { %1048 = vmatpush.msrb.mxu1 %v752_v28 }
0x1466   :  { %1049 = vmatpush.msrb.mxu1 %v751_v29 }
0x1468   :  { %1050 = vmatpush.msrb.mxu1 %v750_v30 }
0x146a   :  { %1051 = vmatpush.msrb.mxu1 %v749_v32 }
0x146b   :  { %1151 = vmatmul.msk.f32.vlgmr.msra.gmra.mxu1 %vm63_vm0, %v912_v27 }
0x14e0   :  { %v841_v35 = vpop.f32.mrf.mxu1 }
0x14e1   :  { %v862_v36 = vadd.f32 %v861_v34, %v841_v35 }
0x14e3   :  { %v868_v63 = vadd.f32 %v1167_v33, %v862_v36 }
0x14e5   :  { %1241 = vtanh.f32 %v868_v63 }
0x14e8   :  { %v937_v37 = vpop.f32.mrf.mxu1 }
0x14e9   :  { %v940_v38 = vmul.f32 1.442695, %v937_v37 }
0x14eb   :  { %v1242_v39 = vpop.eup %1241  ;;  %1243 = vpow2.f32 %v940_v38 }
0x14ec   :  { %1149 = vmatmul.msk.f32.vlgmr.msrb.gmra.mxu0 %vm63_vm0, %v1242_v39 }
0x14f1   :  { %v1244_v1 = vpop.eup %1243 }
0x14f2   :  { %v942_v40 = vsel %vm783_vm12, %v1244_v1, -inf }
0x14f3   :  { %943 = vmax.xlane.f32.xlu1 %v942_v40 }
0x14f4   :  { %1154 = vmatmul.msk.f32.vlgmr.msra.gmra.mxu0 %vm63_vm0, %v912_v27 }
0x1566   :  { %v944_v41 = vpop.xlane.xlu1 %943 }
0x1567   :  { %v945_v42 = vsub.f32 %v1244_v1, %v944_v41 }
0x1569   :  { %v946_v43 = vmul.f32 1.442695, %v945_v42  ;;  %v894_v31 = vpop.f32.mrf.mxu0 }
0x156a   :  { %v895_v47 = vadd.f32 %v1168_v45, %v894_v31 }
0x156b   :  { %1245 = vpow2.f32 %v946_v43 }
0x156c   :  { %v898_v13 = vsel %vm897_vm13, %v895_v47, -inf }
0x1571   :  { %v1246_v44 = vpop.eup %1245  ;;  %v1020_v4 = vpop.f32.mrf.mxu0 }
0x1572   :  { %v948_v46 = vsel %vm783_vm12, %v1246_v44, 0.0 }
0x1573   :  { %949 = vadd.xlane.f32.xlu2 %v948_v46 }
0x157b   :  { %899 = vmax.xlane.f32.xlu2 %v898_v13 }
0x15e6   :  { %v950_v48 = vpop.xlane.xlu2 %949 }
0x15e7   :  { %1247 = vlog2.f32 %v950_v48 }
0x15ed   :  { %v1248_v49 = vpop.eup %1247 }
0x15ee   :  { %v952_v51 = vmul.f32 0.6931472, %v1248_v49  ;;  %v900_v52 = vpop.xlane.xlu2 %899 }
0x15ef   :  { %v901_v53 = vsub.f32 %v895_v47, %v900_v52 }
0x15f0   :  { %v953_v54 = vadd.f32 %v952_v51, %v944_v41 }
0x15f1   :  { %v902_v55 = vmul.f32 1.442695, %v901_v53 }
0x15f2   :  { %v954_v56 = vsub.f32 %v1244_v1, %v953_v54 }
0x15f3   :  { %1249 = vpow2.f32 %v902_v55 }
0x15f4   :  { %956 = vst.msk [vmem:[#allocation7 + $0x8] sm:$0xff] %vm783_vm12, %v954_v56  ;;  %1152 = vmatmul.msk.f32.vlgmr.msrb.gmra.mxu2 %vm783_vm12, %v954_v56 }
0x15f9   :  { %v1250_v57 = vpop.eup %1249 }
0x15fa   :  { %v904_v59 = vsel %vm897_vm13, %v1250_v57, 0.0 }
0x15fb   :  { %905 = vadd.xlane.f32.xlu1 %v904_v59 }
0x166e   :  { %v906_v60 = vpop.xlane.xlu1 %905 }
0x166f   :  { %1251 = vlog2.f32 %v906_v60 }
0x1675   :  { %v1252_v58 = vpop.eup %1251 }
0x1676   :  { %v908_v61 = vmul.f32 0.6931472, %v1252_v58 }
0x1677   :  { %v977_v62 = vpop.f32.mrf.mxu2 }
0x1678   :  { %v909_v0 = vadd.f32 %v908_v61, %v900_v52  ;;  %1153 = vmatmul.msk.f32.vlgmr.msra.gmra.mxu3 %vm63_vm0, %v977_v62 }
0x167a   :  { %v910_v2 = vsub.f32 %v895_v47, %v909_v0 }
0x167c   :  { %911 = vst.msk [vmem:[%s1706_s14] sm:$0xff] %vm897_vm13, %v910_v2 }
0x16fb   :  { %v1000_v5 = vpop.f32.mrf.mxu3 }
0x16fc   :  { %v1021_v6 = vadd.f32 %v1020_v4, %v1000_v5 }
0x16fe   :  { %v1027_v7 = vadd.f32 %v1169_v3, %v1021_v6 }
0x1700   :  { %1253 = vtanh.f32 %v1027_v7 }
0x1706   :  { %v1254_v8 = vpop.eup %1253 }
0x1707   :  { %1155 = vmatmul.msk.f32.vlgmr.msrb.gmra.mxu1 %vm63_vm0, %v1254_v8 }
0x1784   :  { %v1053_v11 = vpop.f32.mrf.mxu1 }
0x1785   :  { %v1054_v12 = vadd.f32 %v1170_v9, %v1053_v11 }
0x1787   :  { %v1056_v10 = vsel %vm897_vm13, %v1054_v12, -inf }
0x1788   :  { %1057 = vmax.xlane.f32.xlu0 %v1056_v10 }
0x179c   :  { %698 = vrot.lane.b32.xlu0 %v1568_v50, %s1337_s21 }
0x17fb   :  { %v1058_v14 = vpop.xlane.xlu0 %1057 }
0x17fc   :  { %v1059_v15 = vsub.f32 %v1054_v12, %v1058_v14 }
0x17fe   :  { %v1060_v16 = vmul.f32 1.442695, %v1059_v15 }
0x1800   :  { %1255 = vpow2.f32 %v1060_v16 }
0x1806   :  { %v1256_v17 = vpop.eup %1255 }
0x1807   :  { %v1062_v18 = vsel %vm897_vm13, %v1256_v17, 0.0 }
0x1808   :  { %1063 = vadd.xlane.f32.xlu2 %v1062_v18 }
0x180e   :  { %v699_v50 = vpop.permute.xlu0 %698 }
0x180f   :  { %701 = vst.msk [vmem:[#allocation5 - $0x6] sm:$0xc0] %vm695_vm11, %v699_v50 }
0x1810   :  { %1094 = dma.vmem_to_hbm [thread:$0]  %s1090_s22, 32, %s1092_s24, [#allocation6]  }
0x1811   :  { %1107 = dma.vmem_to_hbm [thread:$0]  %s1100_s7, 256, %s1102_s4, [#allocation6], %s1341_s16, %s1341_s16, %s1342_s0  }
0x187b   :  { %v1064_v19 = vpop.xlane.xlu2 %1063 }
0x187c   :  { %1257 = vlog2.f32 %v1064_v19 }
0x1882   :  { %v1258_v20 = vpop.eup %1257 }
0x1883   :  { %v1066_v21 = vmul.f32 0.6931472, %v1258_v20 }
0x1885   :  { %v1067_v22 = vadd.f32 %v1066_v21, %v1058_v14 }
0x1887   :  { %v1068_v23 = vsub.f32 %v1054_v12, %v1067_v22 }
0x1889   :  { %1156 = vst.msk [vmem:[%s1706_s14 + $0x8] sm:$0xff] %vm897_vm13, %v1068_v23 }
0x188a   :  { %1331 = dma.done.wait [#allocation4], 32  }
0x188b   :  { %1332 = vsyncadd [#allocation4], 4294967264 }
0x188c   :  { %1333 = dma.done.wait [#allocation6], 288  }
0x188d   :  { %1334 = vsyncadd [#allocation6], 4294967008 }
0x188e   :  { %1122 = vsyncpa [#allocation4], 1 }
0x188f   :  { %1123 = vsyncpa [#allocation6], 1 }

</bundles_post_ra>
